<compile_context>
chip_gen: v7x
topology: tpu7x:2x2x1
jax: 0.10.0
libtpu: 0.0.40
codegen_flags: <defaults>
</compile_context>

<pallas_src>
import jax
import jax.numpy as jnp
import numpy as np
from jax.experimental import pallas as pl
from jax.experimental.pallas import tpu as pltpu


def _fuse_block_ca_kernel(rgb_ref, t_ref, w1_ref, wc2_ref, fh2_ref, fw2_ref,
                          ph_ref, pw_ref, eh_ref, ew_ref,
                          out_ref, poolw_ref, sw_ref):
    # grid = (N, 2, T):  n = batch, p = pass (0: pool accumulation, 1: output),
    #                    t = row tile along H.
    p = pl.program_id(1)
    t = pl.program_id(2)
    C = out_ref.shape[1]

    # Stacked channels: rows 0..C-1 = rgb, rows C..2C-1 = t.   (2C, TH*W)
    x_cat = jnp.concatenate([rgb_ref[0], t_ref[0]], axis=0)

    # ------- pass 0: accumulate the mean-over-H pool (cross-tile reduction) --
    @pl.when((p == 0) & (t == 0))
    def _():
        poolw_ref[...] = jnp.zeros_like(poolw_ref)

    @pl.when(p == 0)
    def _():
        # pw[(j*W + w), w'] = (w == w') / H  ->  partial mean-over-H, (2C, W)
        poolw_ref[...] += jnp.dot(x_cat, pw_ref[...],
                                  preferred_element_type=jnp.float32)

    # ------- pass 1: fused 1x1 conv + coordinate-attention gates --------------
    @pl.when(p == 1)
    def _():
        @pl.when(t == 0)
        def _():
            # W-direction gate, shared by every row tile of this image.
            yw = jnp.maximum(
                jnp.dot(wc2_ref[...], poolw_ref[...],
                        preferred_element_type=jnp.float32), 0.0)    # (2crp, W)
            sw_ref[...] = jax.nn.sigmoid(
                jnp.dot(fw2_ref[...], yw,
                        preferred_element_type=jnp.float32))         # (2C, W)

        # H-direction gate is purely local to this row tile.
        pool_h = jnp.dot(x_cat, ph_ref[...],
                         preferred_element_type=jnp.float32)         # (2C, TH)
        yh = jnp.maximum(
            jnp.dot(wc2_ref[...], pool_h,
                    preferred_element_type=jnp.float32), 0.0)        # (2crp, TH)
        s_h = jax.nn.sigmoid(
            jnp.dot(fh2_ref[...], yh,
                    preferred_element_type=jnp.float32))             # (2C, TH)

        # Lane-dense broadcast of the gates over the tile: (2C, TH*W).
        sh_exp = jnp.dot(s_h, eh_ref[...], preferred_element_type=jnp.float32)
        sw_exp = jnp.dot(sw_ref[...], ew_ref[...],
                         preferred_element_type=jnp.float32)

        # conv1x1 on concat(rgb, t):  (C, 2C) @ (2C, TH*W), N = spatial axis.
        c = jnp.dot(w1_ref[...], x_cat,
                    preferred_element_type=jnp.float32)              # (C, TH*W)

        gate = sh_exp[:C] * sw_exp[:C] + sh_exp[C:] * sw_exp[C:]     # (C, TH*W)
        out_ref[0] = (c * gate).astype(out_ref.dtype)


def _block_diag2(a):
    """[[a, 0], [0, a]] for a 2-D matrix, in float32."""
    a = jnp.asarray(a, jnp.float32)
    m, n = a.shape
    z = jnp.zeros((m, n), jnp.float32)
    top = jnp.concatenate([a, z], axis=1)
    bot = jnp.concatenate([z, a], axis=1)
    return jnp.concatenate([top, bot], axis=0)


def _round_up(x, m):
    return ((x + m - 1) // m) * m


def _choose_tile_h(C, H, W):
    """Row-tile height: TH*W a multiple of 128 (lane-dense), VMEM-bounded."""
    # Budget the big pipelined buffers (2 inputs + 1 output, double-buffered).
    budget_bytes = 24 * 1024 * 1024
    max_lanes = max(128, min(4096, (budget_bytes // (6 * 4 * max(C, 1)))
                             // 128 * 128))
    cands = [th for th in range(1, H + 1)
             if H % th == 0 and (th * W) % 128 == 0]
    if not cands:
        return H                       # fall back to one full-image tile
    good = [th for th in cands if th * W <= max_lanes]
    return max(good) if good else min(cands)


def fuse_block_ca(rgb_nchw, t_nchw, params, tile_h=None):
    """Inputs/outputs are NCHW float32, matching the PyTorch module."""
    w1 = jnp.asarray(params["conv1x1"], jnp.float32)   # (C, 2C)  (out, in)
    wc = jnp.asarray(params["conv_1x1"], jnp.float32)  # (cr, C)
    fh = jnp.asarray(params["F_h"], jnp.float32)       # (C, cr)
    fw = jnp.asarray(params["F_w"], jnp.float32)       # (C, cr)

    N, C, H, W = rgb_nchw.shape
    cr = wc.shape[0]
    assert w1.shape == (C, 2 * C) and fh.shape == (C, cr) and fw.shape == (C, cr)

    if tile_h is None:
        TH = _choose_tile_h(C, H, W)
    else:
        assert H % tile_h == 0 and (tile_h == H or (tile_h * W) % 128 == 0)
        TH = tile_h
    T = H // TH
    THW = TH * W

    # Free, contiguous reshapes (no transposes): channel-major, lanes = H*W.
    rgb3 = jnp.asarray(rgb_nchw, jnp.float32).reshape(N, C, H * W)
    t3 = jnp.asarray(t_nchw, jnp.float32).reshape(N, C, H * W)

    # Block-diagonal weights so the rgb and t attention branches share matmuls.
    # Pad the reduced channel dim (2*cr) up to a multiple of 8 (sublane align);
    # the padded rows/cols are zero, so relu(0)=0 contributes nothing.
    crp = max(8, _round_up(2 * cr, 8))
    wc2 = jnp.pad(_block_diag2(wc), ((0, crp - 2 * cr), (0, 0)))    # (crp, 2C)
    fh2 = jnp.pad(_block_diag2(fh), ((0, 0), (0, crp - 2 * cr)))    # (2C, crp)
    fw2 = jnp.pad(_block_diag2(fw), ((0, 0), (0, crp - 2 * cr)))    # (2C, crp)

    # Selector matrices: pooling and gate broadcast as lane-dense matmuls.
    idx = np.arange(THW)
    jrow = idx // W
    wcol = idx % W
    ph = np.zeros((THW, TH), np.float32); ph[idx, jrow] = 1.0 / W   # mean over W
    pw = np.zeros((THW, W), np.float32);  pw[idx, wcol] = 1.0 / H   # mean over H
    eh = np.zeros((TH, THW), np.float32); eh[jrow, idx] = 1.0       # expand s_h
    ew = np.zeros((W, THW), np.float32);  ew[wcol, idx] = 1.0       # expand s_w

    out = pl.pallas_call(
        _fuse_block_ca_kernel,
        out_shape=jax.ShapeDtypeStruct((N, C, H * W), jnp.float32),
        grid_spec=pltpu.PrefetchScalarGridSpec(
            num_scalar_prefetch=0,
            grid=(N, 2, T),
            in_specs=[
                pl.BlockSpec((1, C, THW), lambda n, p, s: (n, 0, s)),
                pl.BlockSpec((1, C, THW), lambda n, p, s: (n, 0, s)),
                pl.BlockSpec((C, 2 * C), lambda n, p, s: (0, 0)),
                pl.BlockSpec((crp, 2 * C), lambda n, p, s: (0, 0)),
                pl.BlockSpec((2 * C, crp), lambda n, p, s: (0, 0)),
                pl.BlockSpec((2 * C, crp), lambda n, p, s: (0, 0)),
                pl.BlockSpec((THW, TH), lambda n, p, s: (0, 0)),
                pl.BlockSpec((THW, W), lambda n, p, s: (0, 0)),
                pl.BlockSpec((TH, THW), lambda n, p, s: (0, 0)),
                pl.BlockSpec((W, THW), lambda n, p, s: (0, 0)),
            ],
            # During pass 0 the output block index is pinned to tile 0 so no
            # garbage writebacks happen; pass 1 walks the tiles and writes.
            out_specs=pl.BlockSpec((1, C, THW), lambda n, p, s: (n, 0, p * s)),
            scratch_shapes=[
                pltpu.VMEM((2 * C, W), jnp.float32),   # accumulated mean-over-H
                pltpu.VMEM((2 * C, W), jnp.float32),   # W-direction gates s_w
            ],
        ),
        compiler_params=pltpu.CompilerParams(
            dimension_semantics=("parallel", "arbitrary", "arbitrary"),
            vmem_limit_bytes=32 * 1024 * 1024,
        ),
    )(rgb3, t3, w1, wc2, fh2, fw2,
      jnp.asarray(ph), jnp.asarray(pw), jnp.asarray(eh), jnp.asarray(ew))

    return out.reshape(N, C, H, W)


def _reference_nchw(rgb, t, params):
    """Pure-JAX NCHW reference mirroring the PyTorch forward, for verification."""
    w1, wc, fh, fw = (params["conv1x1"], params["conv_1x1"],
                      params["F_h"], params["F_w"])
    H = rgb.shape[2]
    c = jnp.einsum("oi,nihw->nohw", w1, jnp.concatenate([rgb, t], axis=1))

    def branch(x):
        xh = jnp.mean(x, axis=3, keepdims=True)                # (N,C,H,1)
        xw = jnp.transpose(jnp.mean(x, axis=2, keepdims=True),
                           (0, 1, 3, 2))                       # (N,C,W,1)
        cat = jnp.concatenate([xh, xw], axis=2)                # (N,C,H+W,1)
        y = jax.nn.relu(jnp.einsum("ri,nisl->nrsl", wc, cat))
        yh, yw = y[:, :, :H], y[:, :, H:]
        sh = jax.nn.sigmoid(jnp.einsum("or,nrsl->nosl", fh, yh))          # (N,C,H,1)
        sw = jax.nn.sigmoid(jnp.einsum("or,nrsl->nosl", fw,
                                       jnp.transpose(yw, (0, 1, 3, 2))))  # (N,C,1,W)
        return sh * sw

    return c * (branch(rgb) + branch(t))


if __name__ == "__main__":
    # Small deterministic configuration (ch=32, reduction=16 -> cr=2).
    N, CH, H, W = 2, 32, 16, 16
    REDUCTION = 16
    CR = CH // REDUCTION

    key = jax.random.PRNGKey(0)
    k_rgb, k_t, k_w1, k_wc, k_fh, k_fw = jax.random.split(key, 6)

    rgb = jax.random.normal(k_rgb, (N, CH, H, W), dtype=jnp.float32)
    t = jax.random.normal(k_t, (N, CH, H, W), dtype=jnp.float32)

    params = {
        "conv1x1": 0.1 * jax.random.normal(k_w1, (CH, 2 * CH), dtype=jnp.float32),
        "conv_1x1": 0.1 * jax.random.normal(k_wc, (CR, CH), dtype=jnp.float32),
        "F_h": 0.1 * jax.random.normal(k_fh, (CH, CR), dtype=jnp.float32),
        "F_w": 0.1 * jax.random.normal(k_fw, (CH, CR), dtype=jnp.float32),
    }

    ref = jax.block_until_ready(_reference_nchw(rgb, t, params))

    # Auto tile choice (single full-image tile for this small shape).
    out = jax.block_until_ready(fuse_block_ca(rgb, t, params))
    assert out.shape == (N, CH, H, W)
    np.testing.assert_allclose(np.asarray(out), np.asarray(ref),
                               rtol=5e-4, atol=5e-4)

    # Forced multi-tile run (TH=8 -> 2 row tiles) to exercise the cross-tile
    # mean-over-H accumulation path.
    out_tiled = jax.block_until_ready(fuse_block_ca(rgb, t, params, tile_h=8))
    np.testing.assert_allclose(np.asarray(out_tiled), np.asarray(ref),
                               rtol=5e-4, atol=5e-4)

    print("KERNEL_OK")
</pallas_src>

<mosaic_0001>
module attributes {stable_mosaic.version = 11 : i64} {
  func.func @_fuse_block_ca_kernel(%arg0: i32, %arg1: i32, %arg2: i32, %arg3: memref<1x32x256xf32, #tpu.memory_space<vmem>>, %arg4: memref<1x32x256xf32, #tpu.memory_space<vmem>>, %arg5: memref<32x64xf32, #tpu.memory_space<vmem>>, %arg6: memref<8x64xf32, #tpu.memory_space<vmem>>, %arg7: memref<64x8xf32, #tpu.memory_space<vmem>>, %arg8: memref<64x8xf32, #tpu.memory_space<vmem>>, %arg9: memref<256x16xf32, #tpu.memory_space<vmem>>, %arg10: memref<256x16xf32, #tpu.memory_space<vmem>>, %arg11: memref<16x256xf32, #tpu.memory_space<vmem>>, %arg12: memref<16x256xf32, #tpu.memory_space<vmem>>, %arg13: memref<1x32x256xf32, #tpu.memory_space<vmem>>, %arg14: memref<64x16xf32, #tpu.memory_space<vmem>>, %arg15: memref<64x16xf32, #tpu.memory_space<vmem>>) attributes {dimension_semantics = [#tpu.dimension_semantics<parallel>, #tpu.dimension_semantics<arbitrary>, #tpu.dimension_semantics<arbitrary>], iteration_bounds = array<i64: 2, 2, 1>, scalar_prefetch = 0 : i64, scratch_operands = 2 : i64, tpu.core_type = #tpu.core_type<tc>, window_params = [{transform_indices = @transform_0, window_bounds = array<i64: 1, 32, 256>}, {transform_indices = @transform_1, window_bounds = array<i64: 1, 32, 256>}, {pipeline_mode = #tpu.pipeline_mode<synchronous>, transform_indices = @transform_2, window_bounds = array<i64: 32, 64>}, {pipeline_mode = #tpu.pipeline_mode<synchronous>, transform_indices = @transform_3, window_bounds = array<i64: 8, 64>}, {pipeline_mode = #tpu.pipeline_mode<synchronous>, transform_indices = @transform_4, window_bounds = array<i64: 64, 8>}, {pipeline_mode = #tpu.pipeline_mode<synchronous>, transform_indices = @transform_5, window_bounds = array<i64: 64, 8>}, {pipeline_mode = #tpu.pipeline_mode<synchronous>, transform_indices = @transform_6, window_bounds = array<i64: 256, 16>}, {pipeline_mode = #tpu.pipeline_mode<synchronous>, transform_indices = @transform_7, window_bounds = array<i64: 256, 16>}, {pipeline_mode = #tpu.pipeline_mode<synchronous>, transform_indices = @transform_8, window_bounds = array<i64: 16, 256>}, {pipeline_mode = #tpu.pipeline_mode<synchronous>, transform_indices = @transform_9, window_bounds = array<i64: 16, 256>}, {transform_indices = @transform_10, window_bounds = array<i64: 1, 32, 256>}]} {
    %c0 = arith.constant 0 : index
    %c0_0 = arith.constant 0 : index
    %c0_1 = arith.constant 0 : index
    %0 = vector.load %arg3[%c0, %c0_0, %c0_1] : memref<1x32x256xf32, #tpu.memory_space<vmem>>, vector<1x32x256xf32>
    %1 = vector.shape_cast %0 : vector<1x32x256xf32> to vector<32x256xf32>
    %c0_2 = arith.constant 0 : index
    %c0_3 = arith.constant 0 : index
    %c0_4 = arith.constant 0 : index
    %2 = vector.load %arg4[%c0_2, %c0_3, %c0_4] : memref<1x32x256xf32, #tpu.memory_space<vmem>>, vector<1x32x256xf32>
    %3 = vector.shape_cast %2 : vector<1x32x256xf32> to vector<32x256xf32>
    %4 = tpu.concatenate %1, %3 in 0 : vector<32x256xf32>, vector<32x256xf32> -> vector<64x256xf32>
    %c0_i32 = arith.constant 0 : i32
    %5 = arith.cmpi eq, %arg1, %c0_i32 : i32
    %c0_i32_5 = arith.constant 0 : i32
    %6 = arith.cmpi eq, %arg2, %c0_i32_5 : i32
    %7 = arith.andi %5, %6 : i1
    %8 = arith.extui %7 : i1 to i32
    %c0_i32_6 = arith.constant 0 : i32
    %9 = arith.cmpi ne, %8, %c0_i32_6 : i32
    scf.if %9 {
      %cst = arith.constant 0.000000e+00 : f32
      %16 = vector.broadcast %cst : f32 to vector<64x16xf32>
      %c0_10 = arith.constant 0 : index
      %c0_11 = arith.constant 0 : index
      %17 = vector.load %arg14[%c0_10, %c0_11] : memref<64x16xf32, #tpu.memory_space<vmem>>, vector<64x16xf32>
      tpu.vector_store %arg14[%c0_10, %c0_11], %16 {strides = array<i32>} : memref<64x16xf32, #tpu.memory_space<vmem>>, vector<64x16xf32>,
    } else {
    }
    %c0_i32_7 = arith.constant 0 : i32
    %10 = arith.cmpi eq, %arg1, %c0_i32_7 : i32
    %11 = arith.extui %10 : i1 to i32
    %c0_i32_8 = arith.constant 0 : i32
    %12 = arith.cmpi ne, %11, %c0_i32_8 : i32
    scf.if %12 {
      %c0_10 = arith.constant 0 : index
      %c0_11 = arith.constant 0 : index
      %16 = vector.load %arg14[%c0_10, %c0_11] : memref<64x16xf32, #tpu.memory_space<vmem>>, vector<64x16xf32>
      %c0_12 = arith.constant 0 : index
      %c0_13 = arith.constant 0 : index
      %17 = vector.load %arg10[%c0_12, %c0_13] : memref<256x16xf32, #tpu.memory_space<vmem>>, vector<256x16xf32>
      %cst = arith.constant dense<0.000000e+00> : vector<64x16xf32>
      %18 = tpu.matmul %4, %17, %cst {dimension_numbers = #tpu.dot_dimension_numbers<[1], [0], [0], [1], [0, 0, 1, 1], [], []>} : vector<64x256xf32>, vector<256x16xf32>, vector<64x16xf32> -> vector<64x16xf32>
      %19 = arith.addf %16, %18 : vector<64x16xf32>
      %c0_14 = arith.constant 0 : index
      %c0_15 = arith.constant 0 : index
      %20 = vector.load %arg14[%c0_14, %c0_15] : memref<64x16xf32, #tpu.memory_space<vmem>>, vector<64x16xf32>
      tpu.vector_store %arg14[%c0_14, %c0_15], %19 {strides = array<i32>} : memref<64x16xf32, #tpu.memory_space<vmem>>, vector<64x16xf32>,
    } else {
    }
    %c1_i32 = arith.constant 1 : i32
    %13 = arith.cmpi eq, %arg1, %c1_i32 : i32
    %14 = arith.extui %13 : i1 to i32
    %c0_i32_9 = arith.constant 0 : i32
    %15 = arith.cmpi ne, %14, %c0_i32_9 : i32
    scf.if %15 {
      %c0_i32_10 = arith.constant 0 : i32
      %16 = arith.cmpi eq, %arg2, %c0_i32_10 : i32
      %17 = arith.extui %16 : i1 to i32
      %c0_i32_11 = arith.constant 0 : i32
      %18 = arith.cmpi ne, %17, %c0_i32_11 : i32
      scf.if %18 {
        %c0_36 = arith.constant 0 : index
        %c0_37 = arith.constant 0 : index
        %50 = vector.load %arg6[%c0_36, %c0_37] : memref<8x64xf32, #tpu.memory_space<vmem>>, vector<8x64xf32>
        %c0_38 = arith.constant 0 : index
        %c0_39 = arith.constant 0 : index
        %51 = vector.load %arg14[%c0_38, %c0_39] : memref<64x16xf32, #tpu.memory_space<vmem>>, vector<64x16xf32>
        %cst_40 = arith.constant dense<0.000000e+00> : vector<8x16xf32>
        %52 = tpu.matmul %50, %51, %cst_40 {dimension_numbers = #tpu.dot_dimension_numbers<[1], [0], [0], [1], [0, 0, 1, 1], [], []>} : vector<8x64xf32>, vector<64x16xf32>, vector<8x16xf32> -> vector<8x16xf32>
        %cst_41 = arith.constant 0.000000e+00 : f32
        %53 = vector.broadcast %cst_41 : f32 to vector<8x16xf32>
        %54 = arith.maximumf %52, %53 : vector<8x16xf32>
        %c0_42 = arith.constant 0 : index
        %c0_43 = arith.constant 0 : index
        %55 = vector.load %arg8[%c0_42, %c0_43] : memref<64x8xf32, #tpu.memory_space<vmem>>, vector<64x8xf32>
        %cst_44 = arith.constant dense<0.000000e+00> : vector<64x16xf32>
        %56 = tpu.matmul %55, %54, %cst_44 {dimension_numbers = #tpu.dot_dimension_numbers<[1], [0], [0], [1], [0, 0, 1, 1], [], []>} : vector<64x8xf32>, vector<8x16xf32>, vector<64x16xf32> -> vector<64x16xf32>
        %57 = arith.negf %56 : vector<64x16xf32>
        %58 = math.exp %57 : vector<64x16xf32>
        %cst_45 = arith.constant 1.000000e+00 : f32
        %59 = vector.broadcast %cst_45 : f32 to vector<64x16xf32>
        %60 = arith.addf %59, %58 : vector<64x16xf32>
        %61 = arith.divf %59, %60 : vector<64x16xf32>
        %c0_46 = arith.constant 0 : index
        %c0_47 = arith.constant 0 : index
        %62 = vector.load %arg15[%c0_46, %c0_47] : memref<64x16xf32, #tpu.memory_space<vmem>>, vector<64x16xf32>
        tpu.vector_store %arg15[%c0_46, %c0_47], %61 {strides = array<i32>} : memref<64x16xf32, #tpu.memory_space<vmem>>, vector<64x16xf32>,
      } else {
      }
      %c0_12 = arith.constant 0 : index
      %c0_13 = arith.constant 0 : index
      %19 = vector.load %arg9[%c0_12, %c0_13] : memref<256x16xf32, #tpu.memory_space<vmem>>, vector<256x16xf32>
      %cst = arith.constant dense<0.000000e+00> : vector<64x16xf32>
      %20 = tpu.matmul %4, %19, %cst {dimension_numbers = #tpu.dot_dimension_numbers<[1], [0], [0], [1], [0, 0, 1, 1], [], []>} : vector<64x256xf32>, vector<256x16xf32>, vector<64x16xf32> -> vector<64x16xf32>
      %c0_14 = arith.constant 0 : index
      %c0_15 = arith.constant 0 : index
      %21 = vector.load %arg6[%c0_14, %c0_15] : memref<8x64xf32, #tpu.memory_space<vmem>>, vector<8x64xf32>
      %cst_16 = arith.constant dense<0.000000e+00> : vector<8x16xf32>
      %22 = tpu.matmul %21, %20, %cst_16 {dimension_numbers = #tpu.dot_dimension_numbers<[1], [0], [0], [1], [0, 0, 1, 1], [], []>} : vector<8x64xf32>, vector<64x16xf32>, vector<8x16xf32> -> vector<8x16xf32>
      %cst_17 = arith.constant 0.000000e+00 : f32
      %23 = vector.broadcast %cst_17 : f32 to vector<8x16xf32>
      %24 = arith.maximumf %22, %23 : vector<8x16xf32>
      %c0_18 = arith.constant 0 : index
      %c0_19 = arith.constant 0 : index
      %25 = vector.load %arg7[%c0_18, %c0_19] : memref<64x8xf32, #tpu.memory_space<vmem>>, vector<64x8xf32>
      %cst_20 = arith.constant dense<0.000000e+00> : vector<64x16xf32>
      %26 = tpu.matmul %25, %24, %cst_20 {dimension_numbers = #tpu.dot_dimension_numbers<[1], [0], [0], [1], [0, 0, 1, 1], [], []>} : vector<64x8xf32>, vector<8x16xf32>, vector<64x16xf32> -> vector<64x16xf32>
      %27 = arith.negf %26 : vector<64x16xf32>
      %28 = math.exp %27 : vector<64x16xf32>
      %cst_21 = arith.constant 1.000000e+00 : f32
      %29 = vector.broadcast %cst_21 : f32 to vector<64x16xf32>
      %30 = arith.addf %29, %28 : vector<64x16xf32>
      %31 = arith.divf %29, %30 : vector<64x16xf32>
      %c0_22 = arith.constant 0 : index
      %c0_23 = arith.constant 0 : index
      %32 = vector.load %arg11[%c0_22, %c0_23] : memref<16x256xf32, #tpu.memory_space<vmem>>, vector<16x256xf32>
      %cst_24 = arith.constant dense<0.000000e+00> : vector<64x256xf32>
      %33 = tpu.matmul %31, %32, %cst_24 {dimension_numbers = #tpu.dot_dimension_numbers<[1], [0], [0], [1], [0, 0, 1, 1], [], []>} : vector<64x16xf32>, vector<16x256xf32>, vector<64x256xf32> -> vector<64x256xf32>
      %c0_25 = arith.constant 0 : index
      %c0_26 = arith.constant 0 : index
      %34 = vector.load %arg15[%c0_25, %c0_26] : memref<64x16xf32, #tpu.memory_space<vmem>>, vector<64x16xf32>
      %c0_27 = arith.constant 0 : index
      %c0_28 = arith.constant 0 : index
      %35 = vector.load %arg12[%c0_27, %c0_28] : memref<16x256xf32, #tpu.memory_space<vmem>>, vector<16x256xf32>
      %cst_29 = arith.constant dense<0.000000e+00> : vector<64x256xf32>
      %36 = tpu.matmul %34, %35, %cst_29 {dimension_numbers = #tpu.dot_dimension_numbers<[1], [0], [0], [1], [0, 0, 1, 1], [], []>} : vector<64x16xf32>, vector<16x256xf32>, vector<64x256xf32> -> vector<64x256xf32>
      %c0_30 = arith.constant 0 : index
      %c0_31 = arith.constant 0 : index
      %37 = vector.load %arg5[%c0_30, %c0_31] : memref<32x64xf32, #tpu.memory_space<vmem>>, vector<32x64xf32>
      %cst_32 = arith.constant dense<0.000000e+00> : vector<32x256xf32>
      %38 = tpu.matmul %37, %4, %cst_32 {dimension_numbers = #tpu.dot_dimension_numbers<[1], [0], [0], [1], [0, 0, 1, 1], [], []>} : vector<32x64xf32>, vector<64x256xf32>, vector<32x256xf32> -> vector<32x256xf32>
      %39 = vector.extract_strided_slice %33 {offsets = [0, 0], sizes = [32, 256], strides = [1, 1]} : vector<64x256xf32> to vector<32x256xf32>
      %40 = vector.extract_strided_slice %36 {offsets = [0, 0], sizes = [32, 256], strides = [1, 1]} : vector<64x256xf32> to vector<32x256xf32>
      %41 = arith.mulf %39, %40 : vector<32x256xf32>
      %42 = vector.extract_strided_slice %33 {offsets = [32, 0], sizes = [32, 256], strides = [1, 1]} : vector<64x256xf32> to vector<32x256xf32>
      %43 = vector.extract_strided_slice %36 {offsets = [32, 0], sizes = [32, 256], strides = [1, 1]} : vector<64x256xf32> to vector<32x256xf32>
      %44 = arith.mulf %42, %43 : vector<32x256xf32>
      %45 = arith.addf %41, %44 : vector<32x256xf32>
      %46 = arith.mulf %38, %45 : vector<32x256xf32>
      %c0_33 = arith.constant 0 : index
      %c0_34 = arith.constant 0 : index
      %c0_35 = arith.constant 0 : index
      %47 = vector.load %arg13[%c0_33, %c0_34, %c0_35] : memref<1x32x256xf32, #tpu.memory_space<vmem>>, vector<1x32x256xf32>
      %48 = vector.shape_cast %47 : vector<1x32x256xf32> to vector<32x256xf32>
      %49 = vector.shape_cast %46 : vector<32x256xf32> to vector<1x32x256xf32>
      tpu.vector_store %arg13[%c0_33, %c0_34, %c0_35], %49 {strides = array<i32>} : memref<1x32x256xf32, #tpu.memory_space<vmem>>, vector<1x32x256xf32>,
    } else {
    }
    return
  }
  func.func @transform_0(%arg0: i32, %arg1: i32, %arg2: i32) -> (i32, i32, i32) {
    %c0_i32 = arith.constant 0 : i32
    %c0_i32_0 = arith.constant 0 : i32
    return %arg0, %c0_i32, %arg2 : i32, i32, i32
  }
  func.func @transform_1(%arg0: i32, %arg1: i32, %arg2: i32) -> (i32, i32, i32) {
    %c0_i32 = arith.constant 0 : i32
    %c0_i32_0 = arith.constant 0 : i32
    return %arg0, %c0_i32, %arg2 : i32, i32, i32
  }
  func.func @transform_2(%arg0: i32, %arg1: i32, %arg2: i32) -> (i32, i32) {
    %c0_i32 = arith.constant 0 : i32
    %c0_i32_0 = arith.constant 0 : i32
    %c0_i32_1 = arith.constant 0 : i32
    return %c0_i32, %c0_i32_0 : i32, i32
  }
  func.func @transform_3(%arg0: i32, %arg1: i32, %arg2: i32) -> (i32, i32) {
    %c0_i32 = arith.constant 0 : i32
    %c0_i32_0 = arith.constant 0 : i32
    %c0_i32_1 = arith.constant 0 : i32
    return %c0_i32, %c0_i32_0 : i32, i32
  }
  func.func @transform_4(%arg0: i32, %arg1: i32, %arg2: i32) -> (i32, i32) {
    %c0_i32 = arith.constant 0 : i32
    %c0_i32_0 = arith.constant 0 : i32
    %c0_i32_1 = arith.constant 0 : i32
    return %c0_i32, %c0_i32_0 : i32, i32
  }
  func.func @transform_5(%arg0: i32, %arg1: i32, %arg2: i32) -> (i32, i32) {
    %c0_i32 = arith.constant 0 : i32
    %c0_i32_0 = arith.constant 0 : i32
    %c0_i32_1 = arith.constant 0 : i32
    return %c0_i32, %c0_i32_0 : i32, i32
  }
  func.func @transform_6(%arg0: i32, %arg1: i32, %arg2: i32) -> (i32, i32) {
    %c0_i32 = arith.constant 0 : i32
    %c0_i32_0 = arith.constant 0 : i32
    %c0_i32_1 = arith.constant 0 : i32
    return %c0_i32, %c0_i32_0 : i32, i32
  }
  func.func @transform_7(%arg0: i32, %arg1: i32, %arg2: i32) -> (i32, i32) {
    %c0_i32 = arith.constant 0 : i32
    %c0_i32_0 = arith.constant 0 : i32
    %c0_i32_1 = arith.constant 0 : i32
    return %c0_i32, %c0_i32_0 : i32, i32
  }
  func.func @transform_8(%arg0: i32, %arg1: i32, %arg2: i32) -> (i32, i32) {
    %c0_i32 = arith.constant 0 : i32
    %c0_i32_0 = arith.constant 0 : i32
    %c0_i32_1 = arith.constant 0 : i32
    return %c0_i32, %c0_i32_0 : i32, i32
  }
  func.func @transform_9(%arg0: i32, %arg1: i32, %arg2: i32) -> (i32, i32) {
    %c0_i32 = arith.constant 0 : i32
    %c0_i32_0 = arith.constant 0 : i32
    %c0_i32_1 = arith.constant 0 : i32
    return %c0_i32, %c0_i32_0 : i32, i32
  }
  func.func @transform_10(%arg0: i32, %arg1: i32, %arg2: i32) -> (i32, i32, i32) {
    %0 = arith.muli %arg1, %arg2 : i32
    %c0_i32 = arith.constant 0 : i32
    %c0_i32_0 = arith.constant 0 : i32
    return %arg0, %c0_i32, %0 : i32, i32, i32
  }
}

</mosaic_0001>

<bundles_post_ra>
// kernel: tpu_custom_call.1
= control target key start
LH: loop header
LB: loop body
LE: loop exit
PB: predicated region body
PF: predicated region fallthrough
CT: control target
= control target key end

     0   :  { %s3244_s0 = inlined_call_operand.vmem [shape: f32[2,32,256], index: 0, kind: input, shape index: {}]   ;;  %s3245_s1 = inlined_call_operand.vmem [shape: f32[2,32,256], index: 1, kind: input, shape index: {}]   ;;  %s3246_s2 = inlined_call_operand.vmem [shape: f32[32,64], index: 2, kind: input, shape index: {}]   ;;  %s3247_s3 = inlined_call_operand.vmem [shape: f32[8,64], index: 3, kind: input, shape index: {}]   ;;  %s3248_s4 = inlined_call_operand.vmem [shape: f32[64,8], index: 4, kind: input, shape index: {}]   ;;  %s3249_s5 = inlined_call_operand.vmem [shape: f32[64,8], index: 5, kind: input, shape index: {}]   ;;  %s3250_s6 = inlined_call_operand.vmem [shape: f32[256,16], index: 6, kind: input, shape index: {}]   ;;  %s3251_s7 = inlined_call_operand.vmem [shape: f32[256,16], index: 7, kind: input, shape index: {}]   ;;  %s3252_s8 = inlined_call_operand.vmem [shape: f32[16,256], index: 8, kind: input, shape index: {}]   ;;  %s3253_s9 = inlined_call_operand.vmem [shape: f32[16,256], index: 9, kind: input, shape index: {}]   ;;  %s3254_s10 = inlined_call_operand.hbm [shape: f32[2,32,256], index: 10, kind: output, shape index: {}]  }
   0x1   :  { %3258 = sst [smem:[#allocation10_spill]] %s3244_s0 }
   0x2   :  { %15 = vsyncpa [#allocation5], 0 }
   0x3   :  { %17 = vsyncpa [#allocation5 + $0x1], 0  ;;  %s2589_s13 = smov 0   ;;  %s2591_s14 = smov 0  }
   0x4   :  { %s2593_s15 = smov 0   ;;  %s2595_s16 = smov 0  }
   0x5   :  { %s2597_s17 = smov 0   ;;  %s2599_s18 = smov 0  }
   0x6   :  { %s2601_s19 = smov 0   ;;  %s2603_s20 = smov 0  }
   0x7 LB: > { %3259 = sst [smem:[#allocation7_spill]] %s2521_s19  ;;  %s1872_s21 = sadd.s32 4294967295, %s2525_s20   ;;  %s2525_s20 = sphi %s2603_s20, %s23_s20   ;;  %s2521_s19 = sphi %s2601_s19, %s3268_s19   ;;  %s2517_s18 = sphi %s2599_s18, %s3273_s18   ;;  %s2513_s17 = sphi %s2597_s17, %s3266_s17   ;;  %s2509_s16 = sphi %s2595_s16, %s3272_s16   ;;  %s2505_s15 = sphi %s2593_s15, %s3271_s15   ;;  %s2501_s14 = sphi %s2591_s14, %s3270_s14   ;;  %s2497_s13 = sphi %s2589_s13, %s3269_s13  }
   0x8   : > { %s1873_s22 = sadd.s32 4294967294, %s2525_s20   ;;  %s38_s23 = sadd.s32 1, %s2517_s18 }
   0x9   : > { %p40_p0 = scmp.ge.s32.totalorder %s38_s23, 2  ;;  %s42_s24 = sadd.s32 1, %s2521_s19 }
   0xa   : > { %p287_p1 = scmp.ne.s32.totalorder %s2505_s15, %s2501_s14  ;;  %p288_p2 = scmp.eq.s32.totalorder %s1872_s21, 3 }
   0xb   : > { %s3275_s23 = smov (%p40_p0, %s38_s23), 0  ;;  %s3277_s24 = smov (!%p40_p0, %s42_s24), %s2521_s19 }
   0xc   : > { %3260 = sst [smem:[#allocation8_spill]] %s3275_s23  ;;  %p2638_p3 = por %p288_p2, %p287_p1 }
   0xd   : > { %p293_p4 = scmp.ne.s32.totalorder %s2501_s14, %s2497_s13  ;;  %p44_p5 = scmp.ge.s32.totalorder %s3277_s24, 2 }
   0xe   : > { %p294_p6 = scmp.eq.s32.totalorder %s1873_s22, 3  ;;  %p1876_p7 = scmp.ge.s32.totalorder %s2525_s20, 1 }
   0xf   : > { %p362_p8 = scmp.lt.s32.totalorder %s2525_s20, 5  ;;  %s3279_s24 = smov (%p44_p5, %s3277_s24), 0 }
  0x10   : > { %3262 = sst [smem:[#allocation9_spill]] %s3279_s24  ;;  %p2648_p9 = por %p294_p6, %p293_p4 }
  0x11   : > { %p363_p10 = pnand %p1876_p7, %p362_p8  ;;  %s272_s27 = ssub.s32 %s2521_s19, %s3279_s24 }
  0x12   : > { %s277_s28 = sadd.s32 1, %s2505_s15  ;;  %p275_p11 = scmp.eq.s32.totalorder %s272_s27, 0 }
  0x13   : > { %366 = sbr.rel (%p363_p10) target bundleno = 1560 (0x618), region = 60  ;;  %s3257_s30 = sand.u32 (!%p363_p10), 1, %s2501_s14  }
  0x14   : > { %s2656_s29 = scalar_select %p275_p11, %s2505_s15, %s277_s28  }
  0x15   : > { %p414_p12 = scmp.lt.s32.totalorder (!%p363_p10), %s2513_s17, 1  ;;  %s1877_s11 = sshll.u32 (!%p363_p10), %s3257_s30, 6 }
  0x16   : > { %p451_p13 = scmp.eq.s32.totalorder (!%p363_p10), %s2509_s16, 0  ;;  %s3264_s0 = sld [smem:[#allocation10_spill]] (!%p363_p10) }
  0x17   : > { %s2702_s23 = scalar_lea.vmem (!%p363_p10), [#allocation4], %s1877_s11 }
  0x1a   : > { %s415_s12 = scalar_select %p414_p12, %s2513_s17, 1 }
  0x1b   : > { %vm457_vm0 = vcmask (%p451_p13), 130048   ;;  %v2527_v16 = vmov (%p451_p13), 0.0  }
  0x1c   : > { %s1944_s21 = sshll.u32 %s415_s12, 6  ;;  %458 = vst.msk [vmem:[#allocation2] sm:$0xff] (%p451_p13), %vm457_vm0, %v2527_v16  ;;  %459 = vst.msk [vmem:[#allocation2 + $0x8] sm:$0xff] (%p451_p13), %vm457_vm0, %v2527_v16 }
  0x1d   : > { %s421_s24 = scalar_lea.vmem %s3264_s0, %s1944_s21  ;;  %s431_s19 = scalar_lea.vmem %s3245_s1, %s1944_s21  ;;  %460 = vst.msk [vmem:[#allocation2 + $0x10] sm:$0xff] (%p451_p13), %vm457_vm0, %v2527_v16  ;;  %461 = vst.msk [vmem:[#allocation2 + $0x18] sm:$0xff] (%p451_p13), %vm457_vm0, %v2527_v16 }
  0x1e   : > { %v2670_v0 = vld [vmem:[%s421_s24] sm:$0xff]  ;;  %v2672_v1 = vld [vmem:[%s421_s24 + $0x8] sm:$0xff]  ;;  %v2674_v2 = vld [vmem:[%s421_s24 + $0x10] sm:$0xff]  ;;  %456 = sbr.rel (!%p451_p13) target bundleno = 37 (0x25), region = 64  ;;  %462 = vst.msk [vmem:[#allocation2 + $0x20] sm:$0xff] (%p451_p13), %vm457_vm0, %v2527_v16 }
  0x1f   : > { %v2676_v3 = vld [vmem:[%s421_s24 + $0x18] sm:$0xff]  ;;  %v2678_v4 = vld [vmem:[%s421_s24 + $0x20] sm:$0xff]  ;;  %v2680_v5 = vld [vmem:[%s421_s24 + $0x28] sm:$0xff]  ;;  %463 = vst.msk [vmem:[#allocation2 + $0x28] sm:$0xff] (%p451_p13), %vm457_vm0, %v2527_v16 }
  0x20   : > { %v2682_v6 = vld [vmem:[%s421_s24 + $0x30] sm:$0xff]  ;;  %v2684_v7 = vld [vmem:[%s421_s24 + $0x38] sm:$0xff]  ;;  %v2686_v8 = vld [vmem:[%s431_s19] sm:$0xff]  ;;  %464 = vst.msk [vmem:[#allocation2 + $0x30] sm:$0xff] (%p451_p13), %vm457_vm0, %v2527_v16 }
  0x21   : > { %v2688_v9 = vld [vmem:[%s431_s19 + $0x8] sm:$0xff]  ;;  %v2690_v10 = vld [vmem:[%s431_s19 + $0x10] sm:$0xff]  ;;  %v2692_v11 = vld [vmem:[%s431_s19 + $0x18] sm:$0xff]  ;;  %465 = vst.msk [vmem:[#allocation2 + $0x38] sm:$0xff] (%p451_p13), %vm457_vm0, %v2527_v16 }
  0x22   : > { %v2694_v12 = vld [vmem:[%s431_s19 + $0x20] sm:$0xff]  ;;  %v2696_v13 = vld [vmem:[%s431_s19 + $0x28] sm:$0xff]  ;;  %v2698_v14 = vld [vmem:[%s431_s19 + $0x30] sm:$0xff] }
  0x23   : > { %v2700_v15 = vld [vmem:[%s431_s19 + $0x38] sm:$0xff] }
  0x25 PF: > { %p1883_p0 = scmp.ne.s32.totalorder %s2509_s16, 0 }
  0x26   : > { %v493_v17 = vld [vmem:[%s3251_s7 + $0x80] sm:$0xff] (!%p1883_p0)  ;;  %v494_v18 = vld [vmem:[%s3251_s7 + $0x88] sm:$0xff] (!%p1883_p0)  ;;  %573 = vmatprep.mubr.f32.mxu0 (!%p1883_p0), %v2672_v1  ;;  %593 = vmatprep.mubr.f32.mxu1 (!%p1883_p0), %v2688_v9  ;;  %v495_v22 = vld [vmem:[%s3251_s7 + $0x90] sm:$0xff] (!%p1883_p0)  ;;  %vm622_vm1 = vcmask (!%p1883_p0), 130048  }
  0x27   : > { %468 = sbr.rel (%p1883_p0) target bundleno = 303 (0x12f), region = 68  ;;  %v477_v19 = vld [vmem:[%s3251_s7] sm:$0xff] (!%p1883_p0)  ;;  %v2162_v20 = vpack.c.bf16 (!%p1883_p0), %v494_v18, %v493_v17  ;;  %v478_v21 = vld [vmem:[%s3251_s7 + $0x8] sm:$0xff] (!%p1883_p0)  ;;  %v496_v23 = vld [vmem:[%s3251_s7 + $0x98] sm:$0xff] (!%p1883_p0) }
  0x28   : > { %v2164_v24 = vpack.c.bf16 (!%p1883_p0), %v478_v21, %v477_v19  ;;  %v2166_v25 = vpack.c.bf16 (!%p1883_p0), %v496_v23, %v495_v22  ;;  %v479_v26 = vld [vmem:[%s3251_s7 + $0x10] sm:$0xff] (!%p1883_p0)  ;;  %v480_v27 = vld [vmem:[%s3251_s7 + $0x18] sm:$0xff] (!%p1883_p0)  ;;  %v497_v28 = vld [vmem:[%s3251_s7 + $0xa0] sm:$0xff] (!%p1883_p0) }
  0x29   : > { %2163 = vmatprep.subr.bf16.mxu0 (!%p1883_p0), %v2162_v20  ;;  %2274 = vmatprep.subr.bf16.mxu1 (!%p1883_p0), %v2162_v20  ;;  %v498_v29 = vld [vmem:[%s3251_s7 + $0xa8] sm:$0xff] (!%p1883_p0)  ;;  %v2168_v30 = vpack.c.bf16 (!%p1883_p0), %v480_v27, %v479_v26  ;;  %v481_v32 = vld [vmem:[%s3251_s7 + $0x20] sm:$0xff] (!%p1883_p0)  ;;  %v499_v34 = vld [vmem:[%s3251_s7 + $0xb0] sm:$0xff] (!%p1883_p0) }
  0x2a   : > { %2165 = vmatpush3.bf16.msra.mxu0 (!%p1883_p0), %v2164_v24  ;;  %2282 = vmatpush3.bf16.msra.mxu1 (!%p1883_p0), %v2164_v24  ;;  %v2170_v31 = vpack.c.bf16 (!%p1883_p0), %v498_v29, %v497_v28  ;;  %v482_v33 = vld [vmem:[%s3251_s7 + $0x28] sm:$0xff] (!%p1883_p0)  ;;  %v500_v35 = vld [vmem:[%s3251_s7 + $0xb8] sm:$0xff] (!%p1883_p0)  ;;  %v483_v38 = vld [vmem:[%s3251_s7 + $0x30] sm:$0xff] (!%p1883_p0) }
  0x2b   : > { %2167 = vmatprep.subr.bf16.mxu0 (!%p1883_p0), %v2166_v25  ;;  %2275 = vmatprep.subr.bf16.mxu1 (!%p1883_p0), %v2166_v25  ;;  %v2172_v36 = vpack.c.bf16 (!%p1883_p0), %v482_v33, %v481_v32  ;;  %v2174_v37 = vpack.c.bf16 (!%p1883_p0), %v500_v35, %v499_v34  ;;  %v484_v39 = vld [vmem:[%s3251_s7 + $0x38] sm:$0xff] (!%p1883_p0)  ;;  %v501_v40 = vld [vmem:[%s3251_s7 + $0xc0] sm:$0xff] (!%p1883_p0)  ;;  %v502_v41 = vld [vmem:[%s3251_s7 + $0xc8] sm:$0xff] (!%p1883_p0) }
  0x2c   : > { %v2176_v42 = vpack.c.bf16 (!%p1883_p0), %v484_v39, %v483_v38  ;;  %v2178_v43 = vpack.c.bf16 (!%p1883_p0), %v502_v41, %v501_v40  ;;  %v485_v44 = vld [vmem:[%s3251_s7 + $0x40] sm:$0xff] (!%p1883_p0)  ;;  %v486_v45 = vld [vmem:[%s3251_s7 + $0x48] sm:$0xff] (!%p1883_p0)  ;;  %v503_v46 = vld [vmem:[%s3251_s7 + $0xd0] sm:$0xff] (!%p1883_p0) }
  0x2d   : > { %v504_v47 = vld [vmem:[%s3251_s7 + $0xd8] sm:$0xff] (!%p1883_p0)  ;;  %v2180_v48 = vpack.c.bf16 (!%p1883_p0), %v486_v45, %v485_v44  ;;  %v487_v50 = vld [vmem:[%s3251_s7 + $0x50] sm:$0xff] (!%p1883_p0)  ;;  %v505_v52 = vld [vmem:[%s3251_s7 + $0xe0] sm:$0xff] (!%p1883_p0) }
  0x2e   : > { %2169 = vmatpush3.bf16.msra.mxu0 %v2168_v30  ;;  %2283 = vmatpush3.bf16.msra.mxu1 %v2168_v30  ;;  %v2182_v49 = vpack.c.bf16 %v504_v47, %v503_v46  ;;  %v488_v51 = vld [vmem:[%s3251_s7 + $0x58] sm:$0xff]  ;;  %v506_v53 = vld [vmem:[%s3251_s7 + $0xe8] sm:$0xff]  ;;  %v489_v56 = vld [vmem:[%s3251_s7 + $0x60] sm:$0xff] }
  0x2f   : > { %2171 = vmatprep.subr.bf16.mxu0 %v2170_v31  ;;  %2276 = vmatprep.subr.bf16.mxu1 %v2170_v31  ;;  %v2184_v54 = vpack.c.bf16 %v488_v51, %v487_v50  ;;  %v2186_v55 = vpack.c.bf16 %v506_v53, %v505_v52  ;;  %v490_v57 = vld [vmem:[%s3251_s7 + $0x68] sm:$0xff]  ;;  %v507_v58 = vld [vmem:[%s3251_s7 + $0xf0] sm:$0xff]  ;;  %v508_v59 = vld [vmem:[%s3251_s7 + $0xf8] sm:$0xff] }
  0x30   : > { %v2188_v60 = vpack.c.bf16 %v490_v57, %v489_v56  ;;  %v2190_v61 = vpack.c.bf16 %v508_v59, %v507_v58  ;;  %v491_v62 = vld [vmem:[%s3251_s7 + $0x70] sm:$0xff]  ;;  %v492_v63 = vld [vmem:[%s3251_s7 + $0x78] sm:$0xff]  ;;  %v469_v19 = vld [vmem:[#allocation2] sm:$0xff] }
  0x31   : > { %v2192_v16 = vpack.c.bf16 %v492_v63, %v491_v62  ;;  %v473_v21 = vld [vmem:[#allocation2 + $0x20] sm:$0xff]  ;;  %v470_v29 = vld [vmem:[#allocation2 + $0x8] sm:$0xff]  ;;  %v471_v39 = vld [vmem:[#allocation2 + $0x10] sm:$0xff] }
  0x32   : > { %2173 = vmatpush3.bf16.msra.mxu0 %v2172_v36  ;;  %2284 = vmatpush3.bf16.msra.mxu1 %v2172_v36  ;;  %v474_v31 = vld [vmem:[#allocation2 + $0x28] sm:$0xff]  ;;  %v475_v41 = vld [vmem:[#allocation2 + $0x30] sm:$0xff]  ;;  %v476_v51 = vld [vmem:[#allocation2 + $0x38] sm:$0xff] }
  0x33   : > { %2175 = vmatprep.subr.bf16.mxu0 %v2174_v37  ;;  %2277 = vmatprep.subr.bf16.mxu1 %v2174_v37 }
  0x36   : > { %2177 = vmatpush3.bf16.msra.mxu0 %v2176_v42  ;;  %2285 = vmatpush3.bf16.msra.mxu1 %v2176_v42 }
  0x37   : > { %2179 = vmatprep.subr.bf16.mxu0 %v2178_v43  ;;  %2278 = vmatprep.subr.bf16.mxu1 %v2178_v43 }
  0x3a   : > { %2181 = vmatpush3.bf16.msra.mxu0 %v2180_v48  ;;  %2286 = vmatpush3.bf16.msra.mxu1 %v2180_v48 }
  0x3b   : > { %2183 = vmatprep.subr.bf16.mxu0 %v2182_v49  ;;  %2279 = vmatprep.subr.bf16.mxu1 %v2182_v49  ;;  %v472_v49 = vld [vmem:[#allocation2 + $0x18] sm:$0xff] }
  0x3e   : > { %2185 = vmatpush3.bf16.msra.mxu0 %v2184_v54  ;;  %2287 = vmatpush3.bf16.msra.mxu1 %v2184_v54 }
  0x3f   : > { %2187 = vmatprep.subr.bf16.mxu0 %v2186_v55  ;;  %2280 = vmatprep.subr.bf16.mxu1 %v2186_v55 }
  0x42   : > { %2189 = vmatpush3.bf16.msra.mxu0 %v2188_v60  ;;  %2288 = vmatpush3.bf16.msra.mxu1 %v2188_v60 }
  0x43   : > { %2191 = vmatprep.subr.bf16.mxu0 %v2190_v61  ;;  %2281 = vmatprep.subr.bf16.mxu1 %v2190_v61 }
  0x46   : > { %2193 = vmatpush3.bf16.msra.mxu0 %v2192_v16  ;;  %2289 = vmatpush3.bf16.msra.mxu1 %v2192_v16 }
  0x49   : > { %574 = vmatmul.mubr.f32.vlgmr.msra.gmra.mrb[0].mxu0 %v2670_v0  ;;  %594 = vmatmul.mubr.f32.vlgmr.msra.gmra.mrb[0].mxu1 %v2686_v8 }
  0x4a   : > { %578 = vmatprep.mubr.f32.mxu0 %v2676_v3  ;;  %598 = vmatprep.mubr.f32.mxu1 %v2692_v11 }
  0x4d   : > { %579 = vmatmul.mubr.f32.gmra.mrb[2].mxu0 %v2674_v2  ;;  %599 = vmatmul.mubr.f32.gmra.mrb[2].mxu1 %v2690_v10 }
  0x4e   : > { %583 = vmatprep.mubr.f32.mxu0 %v2680_v5  ;;  %603 = vmatprep.mubr.f32.mxu1 %v2696_v13 }
  0x51   : > { %584 = vmatmul.mubr.f32.gmra.mrb[4].mxu0 %v2678_v4  ;;  %604 = vmatmul.mubr.f32.gmra.mrb[4].mxu1 %v2694_v12 }
  0x52   : > { %588 = vmatprep.mubr.f32.mxu0 %v2684_v7  ;;  %608 = vmatprep.mubr.f32.mxu1 %v2700_v15 }
  0x55   : > { %589 = vmatmul.mubr.f32.gmra.mrb[6].mxu0 %v2682_v6  ;;  %609 = vmatmul.mubr.f32.gmra.mrb[6].mxu1 %v2698_v14 }
 0x11c   : > { %v1980_v17 = vpop.f32.mrb[0].mxu0  ;;  %v1992_v18 = vpop.f32.mrb[0].mxu1 }
 0x11d   : > { %v1981_v20 = vpop.f32.mrb[1].mxu0  ;;  %v1993_v22 = vpop.f32.mrb[1].mxu1 }
 0x11e   : > { %v1982_v23 = vadd.f32 %v1981_v20, %v1980_v17  ;;  %v1994_v24 = vadd.f32 %v1993_v22, %v1992_v18 }
 0x120   : > { %v614_v25 = vadd.f32 %v1982_v23, %v469_v19  ;;  %v618_v26 = vadd.f32 %v1994_v24, %v473_v21  ;;  %v1983_v27 = vpop.f32.mrb[2].mxu0  ;;  %v1995_v28 = vpop.f32.mrb[2].mxu1 }
 0x121   : > { %v1984_v30 = vpop.f32.mrb[3].mxu0  ;;  %v1996_v32 = vpop.f32.mrb[3].mxu1 }
 0x122   : > { %623 = vst.msk [vmem:[#allocation2] sm:$0xff] %vm622_vm1, %v614_v25  ;;  %627 = vst.msk [vmem:[#allocation2 + $0x20] sm:$0xff] %vm622_vm1, %v618_v26  ;;  %v1985_v33 = vadd.f32 %v1984_v30, %v1983_v27  ;;  %v1997_v34 = vadd.f32 %v1996_v32, %v1995_v28 }
 0x124   : > { %v615_v35 = vadd.f32 %v1985_v33, %v470_v29  ;;  %v619_v36 = vadd.f32 %v1997_v34, %v474_v31  ;;  %v1986_v37 = vpop.f32.mrb[4].mxu0  ;;  %v1998_v38 = vpop.f32.mrb[4].mxu1 }
 0x125   : > { %v1987_v40 = vpop.f32.mrb[5].mxu0  ;;  %v1999_v42 = vpop.f32.mrb[5].mxu1 }
 0x126   : > { %624 = vst.msk [vmem:[#allocation2 + $0x8] sm:$0xff] %vm622_vm1, %v615_v35  ;;  %628 = vst.msk [vmem:[#allocation2 + $0x28] sm:$0xff] %vm622_vm1, %v619_v36  ;;  %v1988_v43 = vadd.f32 %v1987_v40, %v1986_v37  ;;  %v2000_v44 = vadd.f32 %v1999_v42, %v1998_v38 }
 0x128   : > { %v616_v45 = vadd.f32 %v1988_v43, %v471_v39  ;;  %v620_v46 = vadd.f32 %v2000_v44, %v475_v41  ;;  %v1989_v47 = vpop.f32.mrb[6].mxu0  ;;  %v2001_v48 = vpop.f32.mrb[6].mxu1 }
 0x129   : > { %v1990_v50 = vpop.f32.mrb[7].mxu0  ;;  %v2002_v52 = vpop.f32.mrb[7].mxu1 }
 0x12a   : > { %625 = vst.msk [vmem:[#allocation2 + $0x10] sm:$0xff] %vm622_vm1, %v616_v45  ;;  %629 = vst.msk [vmem:[#allocation2 + $0x30] sm:$0xff] %vm622_vm1, %v620_v46  ;;  %v1991_v53 = vadd.f32 %v1990_v50, %v1989_v47  ;;  %v2003_v54 = vadd.f32 %v2002_v52, %v2001_v48 }
 0x12c   : > { %v617_v55 = vadd.f32 %v1991_v53, %v472_v49  ;;  %v621_v56 = vadd.f32 %v2003_v54, %v476_v51 }
 0x12e   : > { %626 = vst.msk [vmem:[#allocation2 + $0x18] sm:$0xff] %vm622_vm1, %v617_v55  ;;  %630 = vst.msk [vmem:[#allocation2 + $0x38] sm:$0xff] %vm622_vm1, %v621_v56 }
 0x12f PF: > { %p1884_p1 = scmp.ne.s32.totalorder %s2509_s16, 1 }
 0x130   : > { %v639_v57 = vld [vmem:[#allocation2] sm:$0xff] (!%p1884_p1)  ;;  %v640_v58 = vld [vmem:[#allocation2 + $0x8] sm:$0xff] (!%p1884_p1)  ;;  %v2528_v60 = vmov (!%p1884_p1), 0.0|0.0   ;;  %vm2529_vm2 = vmmov (!%p1884_p1), 0   ;;  %v2530_v63 = vmov (!%p1884_p1), 0.0   ;;  %vm647_vm3 = vcmask (!%p1884_p1), 523264  }
 0x131   : > { %634 = sbr.rel (%p1884_p1) target bundleno = 1534 (0x5fe), region = 72  ;;  %v641_v59 = vld [vmem:[#allocation2 + $0x10] sm:$0xff] (!%p1884_p1)  ;;  %2194 = vmatprep.subr.bf16.mxu0 (!%p1884_p1), %v2528_v60  ;;  %v2195_v61 = vpack.c.bf16 (!%p1884_p1), %v640_v58, %v639_v57  ;;  %2112 = vmatprep.mubr.msk.f32.mxu0 (!%p1884_p1), %vm2529_vm2, %v2530_v63  ;;  %v643_v17 = vld [vmem:[#allocation2 + $0x20] sm:$0xff] (!%p1884_p1)  ;;  %v644_v18 = vld [vmem:[#allocation2 + $0x28] sm:$0xff] (!%p1884_p1)  ;;  %vm730_vm4 = vcmask (!%p1884_p1), 64512   ;;  %vm908_vm5 = vcmask (!%p1884_p1), 130048  }
 0x132   : > { %v2201_v19 = vpack.c.bf16 (!%p1884_p1), %v644_v18, %v643_v17  ;;  %v645_v20 = vld [vmem:[#allocation2 + $0x30] sm:$0xff] (!%p1884_p1)  ;;  %v2837_v23 = vld [vmem:[%s3247_s3] sm:$0xff] (!%p1884_p1)  ;;  %v934_v26 = vld [vmem:[%s3250_s6 + $0x88] sm:$0xff] (!%p1884_p1) }
 0x133   : > { %2196 = vmatpush3.bf16.msra.mxu0 (!%p1884_p1), %v2195_v61  ;;  %v722_v24 = vld [vmem:[%s3249_s5] sm:$0xff] (!%p1884_p1)  ;;  %v918_v28 = vld [vmem:[%s3250_s6 + $0x8] sm:$0xff] (!%p1884_p1)  ;;  %v935_v30 = vld [vmem:[%s3250_s6 + $0x90] sm:$0xff] (!%p1884_p1) }
 0x134   : > { %2197 = vmatprep.subr.bf16.mxu0 (!%p1884_p1), %v2528_v60  ;;  %2117 = vmatprep.mubr.msk.f32.mxu1 (!%p1884_p1), %vm730_vm4, %v722_v24  ;;  %v933_v25 = vld [vmem:[%s3250_s6 + $0x80] sm:$0xff] (!%p1884_p1)  ;;  %v936_v31 = vld [vmem:[%s3250_s6 + $0x98] sm:$0xff] (!%p1884_p1)  ;;  %v723_v35 = vld [vmem:[%s3249_s5 + $0x8] sm:$0xff] (!%p1884_p1) }
 0x135   : > { %v642_v62 = vld [vmem:[#allocation2 + $0x18] sm:$0xff] (!%p1884_p1)  ;;  %v917_v27 = vld [vmem:[%s3250_s6] sm:$0xff] (!%p1884_p1)  ;;  %v2206_v34 = vpack.c.bf16 (!%p1884_p1), %v934_v26, %v933_v25  ;;  %v2210_v37 = vpack.c.bf16 (!%p1884_p1), %v936_v31, %v935_v30  ;;  %v919_v38 = vld [vmem:[%s3250_s6 + $0x10] sm:$0xff] (!%p1884_p1) }
 0x136   : > { %v2198_v16 = vpack.c.bf16 (!%p1884_p1), %v642_v62, %v641_v59  ;;  %v646_v21 = vld [vmem:[#allocation2 + $0x38] sm:$0xff] (!%p1884_p1)  ;;  %v2208_v36 = vpack.c.bf16 (!%p1884_p1), %v918_v28, %v917_v27  ;;  %v724_v40 = vld [vmem:[%s3249_s5 + $0x10] sm:$0xff] (!%p1884_p1)  ;;  %v937_v41 = vld [vmem:[%s3250_s6 + $0xa0] sm:$0xff] (!%p1884_p1) }
 0x137   : > { %v2204_v22 = vpack.c.bf16 (!%p1884_p1), %v646_v21, %v645_v20  ;;  %v920_v39 = vld [vmem:[%s3250_s6 + $0x18] sm:$0xff] (!%p1884_p1)  ;;  %v938_v42 = vld [vmem:[%s3250_s6 + $0xa8] sm:$0xff] (!%p1884_p1)  ;;  %v921_v46 = vld [vmem:[%s3250_s6 + $0x20] sm:$0xff] (!%p1884_p1) }
 0x138   : > { %2199 = vmatpush3.bf16.msra.mxu0 %v2198_v16  ;;  %v2212_v43 = vpack.c.bf16 %v920_v39, %v919_v38  ;;  %v725_v44 = vld [vmem:[%s3249_s5 + $0x18] sm:$0xff]  ;;  %v2214_v45 = vpack.c.bf16 %v938_v42, %v937_v41  ;;  %v922_v47 = vld [vmem:[%s3250_s6 + $0x28] sm:$0xff]  ;;  %v726_v48 = vld [vmem:[%s3249_s5 + $0x20] sm:$0xff] }
 0x139   : > { %2200 = vmatprep.subr.bf16.mxu0 %v2528_v60  ;;  %v939_v49 = vld [vmem:[%s3250_s6 + $0xb0] sm:$0xff]  ;;  %v940_v50 = vld [vmem:[%s3250_s6 + $0xb8] sm:$0xff]  ;;  %v2216_v51 = vpack.c.bf16 %v922_v47, %v921_v46  ;;  %v727_v52 = vld [vmem:[%s3249_s5 + $0x28] sm:$0xff] }
 0x13a   : > { %v2218_v53 = vpack.c.bf16 %v940_v50, %v939_v49  ;;  %v923_v54 = vld [vmem:[%s3250_s6 + $0x30] sm:$0xff]  ;;  %v924_v55 = vld [vmem:[%s3250_s6 + $0x38] sm:$0xff]  ;;  %v941_v57 = vld [vmem:[%s3250_s6 + $0xc0] sm:$0xff] }
 0x13b   : > { %v728_v56 = vld [vmem:[%s3249_s5 + $0x30] sm:$0xff]  ;;  %v942_v58 = vld [vmem:[%s3250_s6 + $0xc8] sm:$0xff]  ;;  %v2220_v59 = vpack.c.bf16 %v924_v55, %v923_v54  ;;  %v729_v61 = vld [vmem:[%s3249_s5 + $0x38] sm:$0xff] }
 0x13c   : > { %2202 = vmatpush3.bf16.msra.mxu0 %v2201_v19  ;;  %v2222_v62 = vpack.c.bf16 %v942_v58, %v941_v57  ;;  %v925_v16 = vld [vmem:[%s3250_s6 + $0x40] sm:$0xff]  ;;  %v926_v17 = vld [vmem:[%s3250_s6 + $0x48] sm:$0xff]  ;;  %v943_v18 = vld [vmem:[%s3250_s6 + $0xd0] sm:$0xff] }
 0x13d   : > { %2203 = vmatprep.subr.bf16.mxu0 %v2528_v60  ;;  %v944_v19 = vld [vmem:[%s3250_s6 + $0xd8] sm:$0xff]  ;;  %v2224_v20 = vpack.c.bf16 %v926_v17, %v925_v16  ;;  %v945_v25 = vld [vmem:[%s3250_s6 + $0xe0] sm:$0xff]  ;;  %v946_v26 = vld [vmem:[%s3250_s6 + $0xe8] sm:$0xff] }
 0x13e   : > { %v2226_v21 = vpack.c.bf16 %v944_v19, %v943_v18  ;;  %v928_v24 = vld [vmem:[%s3250_s6 + $0x58] sm:$0xff]  ;;  %v2230_v28 = vpack.c.bf16 %v946_v26, %v945_v25  ;;  %v930_v30 = vld [vmem:[%s3250_s6 + $0x68] sm:$0xff]  ;;  %v947_v31 = vld [vmem:[%s3250_s6 + $0xf0] sm:$0xff] }
 0x13f   : > { %v1467_v38 = vld [vmem:[%s3253_s9 + $0x8] sm:$0xff]  ;;  %v1469_v39 = vld [vmem:[%s3253_s9 + $0x18] sm:$0xff]  ;;  %v1466_v41 = vld [vmem:[%s3253_s9] sm:$0xff] }
 0x140   : > { %2205 = vmatpush3.bf16.msra.mxu0 %v2204_v22  ;;  %v927_v22 = vld [vmem:[%s3250_s6 + $0x50] sm:$0xff] }
 0x141   : > { %2238 = vmatprep.subr.bf16.mxu0 %v2528_v60  ;;  %v2228_v27 = vpack.c.bf16 %v928_v24, %v927_v22  ;;  %v1468_v42 = vld [vmem:[%s3253_s9 + $0x10] sm:$0xff] }
 0x143   : > { %2113 = vmatmul.mubr.msk.f32.vlgmr.msra.gmra.mrb[0].mxu0 %vm647_vm3, %v2837_v23 }
 0x144   : > { %2145 = vmatprep.mubr.msk.f32.mxu0 %vm2529_vm2, %v2530_v63 }
 0x216   : > { %v717_v29 = vpop.f32.mrb[0].mxu0 }
 0x217   : > { %v721_v32 = vmax.f32 %v717_v29, 0.0  ;;  %v2114_v33 = vpop.f32.mrb[1].mxu0  ;;  %v929_v29 = vld [vmem:[%s3250_s6 + $0x60] sm:$0xff] }
 0x218   : > { %v2232_v33 = vpack.c.bf16 %v930_v30, %v929_v29 }
 0x219   : > { %2115 = vmatprep.subr.mxu1 %v721_v32 }
 0x21a   : > { %2116 = vmatpush3.msra.mxu1 %v721_v32  ;;  %v948_v32 = vld [vmem:[%s3250_s6 + $0xf8] sm:$0xff] }
 0x21b   : > { %2118 = vmatmul.mubr.msk.f32.vlgmr.msra.gmra.mrb[0].mxu1 %vm730_vm4, %v723_v35  ;;  %2207 = vmatprep.subr.bf16.mxu1 %v2206_v34  ;;  %v2234_v34 = vpack.c.bf16 %v948_v32, %v947_v31  ;;  %v931_v35 = vld [vmem:[%s3250_s6 + $0x70] sm:$0xff] }
 0x21c   : > { %2209 = vmatpush3.bf16.msra.mxu1 %v2208_v36  ;;  %2120 = vmatprep.mubr.msk.f32.mxu1 %vm730_vm4, %v724_v40  ;;  %v932_v36 = vld [vmem:[%s3250_s6 + $0x78] sm:$0xff]  ;;  %v2254_v40 = vpack.c.bf16 %v1469_v39, %v1467_v38 }
 0x21d   : > { %2211 = vmatprep.subr.bf16.mxu1 %v2210_v37  ;;  %v2236_v37 = vpack.c.bf16 %v932_v36, %v931_v35 }
 0x21f   : > { %2121 = vmatmul.mubr.msk.f32.gmra.mrb[2].mxu1 %vm730_vm4, %v725_v44 }
 0x220   : > { %2213 = vmatpush3.bf16.msra.mxu1 %v2212_v43  ;;  %2123 = vmatprep.mubr.msk.f32.mxu1 %vm730_vm4, %v726_v48  ;;  %v2256_v43 = vpack.c.bf16 %v1468_v42, %v1466_v41 }
 0x221   : > { %2215 = vmatprep.subr.bf16.mxu1 %v2214_v45 }
 0x223   : > { %2124 = vmatmul.mubr.msk.f32.gmra.mrb[4].mxu1 %vm730_vm4, %v727_v52 }
 0x224   : > { %2217 = vmatpush3.bf16.msra.mxu1 %v2216_v51  ;;  %2126 = vmatprep.mubr.msk.f32.mxu1 %vm730_vm4, %v728_v56 }
 0x225   : > { %2219 = vmatprep.subr.bf16.mxu1 %v2218_v53 }
 0x227   : > { %2127 = vmatmul.mubr.msk.f32.gmra.mrb[6].mxu1 %vm730_vm4, %v729_v61 }
 0x228   : > { %2221 = vmatpush3.bf16.msra.mxu1 %v2220_v59  ;;  %1013 = vmatprep.mubr.f32.mxu1 %v2672_v1 }
 0x229   : > { %2223 = vmatprep.subr.bf16.mxu1 %v2222_v62 }
 0x22c   : > { %2225 = vmatpush3.bf16.msra.mxu1 %v2224_v20 }
 0x22d   : > { %2227 = vmatprep.subr.bf16.mxu1 %v2226_v21 }
 0x230   : > { %2229 = vmatpush3.bf16.msra.mxu1 %v2228_v27 }
 0x231   : > { %2231 = vmatprep.subr.bf16.mxu1 %v2230_v28 }
 0x234   : > { %2233 = vmatpush3.bf16.msra.mxu1 %v2232_v33 }
 0x235   : > { %2235 = vmatprep.subr.bf16.mxu1 %v2234_v34 }
 0x238   : > { %2237 = vmatpush3.bf16.msra.mxu1 %v2236_v37 }
 0x239   : > { %2255 = vmatprep.subr.bf16.mxu1 %v2254_v40 }
 0x23b   : > { %1014 = vmatmul.mubr.f32.vlgmr.msra.gmra.mrb[8].mxu1 %v2670_v0 }
 0x23c   : > { %1018 = vmatprep.mubr.f32.mxu1 %v2676_v3  ;;  %2257 = vmatpush1.bf16.msra.mxu1 %v2256_v43 }
 0x23f   : > { %1019 = vmatmul.mubr.f32.gmra.mrb[10].mxu1 %v2674_v2 }
 0x240   : > { %1023 = vmatprep.mubr.f32.mxu1 %v2680_v5 }
 0x243   : > { %1024 = vmatmul.mubr.f32.gmra.mrb[12].mxu1 %v2678_v4 }
 0x244   : > { %1028 = vmatprep.mubr.f32.mxu1 %v2684_v7 }
 0x247   : > { %1029 = vmatmul.mubr.f32.gmra.mrb[14].mxu1 %v2682_v6 }
 0x248   : > { %1033 = vmatprep.mubr.f32.mxu1 %v2688_v9 }
 0x24b   : > { %1034 = vmatmul.mubr.f32.gmra.mrb[16].mxu1 %v2686_v8 }
 0x24c   : > { %1038 = vmatprep.mubr.f32.mxu1 %v2692_v11 }
 0x24f   : > { %1039 = vmatmul.mubr.f32.gmra.mrb[18].mxu1 %v2690_v10 }
 0x250   : > { %1043 = vmatprep.mubr.f32.mxu1 %v2696_v13 }
 0x253   : > { %1044 = vmatmul.mubr.f32.gmra.mrb[20].mxu1 %v2694_v12 }
 0x254   : > { %1048 = vmatprep.mubr.f32.mxu1 %v2700_v15 }
 0x257   : > { %1049 = vmatmul.mubr.f32.gmra.mrb[22].mxu1 %v2698_v14 }
 0x258   : > { %1558 = vmatprep.mubr.f32.mxu1 %v2530_v63 }
 0x2ee   : > { %v2119_v44 = vpop.f32.mrb[0].mxu1 }
 0x2ef   : > { %v1895_v45 = vmul.f32 -1.442695, %v2119_v44  ;;  %v821_v46 = vpop.f32.mrb[1].mxu1 }
 0x2f0   : > { %v1894_v47 = vmul.f32 -1.442695, %v821_v46 }
 0x2f1   : > { %2367 = vpow2.f32 %v1895_v45 }
 0x2f2   : > { %2369 = vpow2.f32 %v1894_v47  ;;  %v2122_v48 = vpop.f32.mrb[2].mxu1 }
 0x2f3   : > { %v1897_v49 = vmul.f32 -1.442695, %v2122_v48  ;;  %v831_v50 = vpop.f32.mrb[3].mxu1 }
 0x2f4   : > { %v1896_v51 = vmul.f32 -1.442695, %v831_v50 }
 0x2f5   : > { %2371 = vpow2.f32 %v1897_v49 }
 0x2f6   : > { %2373 = vpow2.f32 %v1896_v51  ;;  %v2125_v52 = vpop.f32.mrb[4].mxu1 }
 0x2f7   : > { %v1899_v53 = vmul.f32 -1.442695, %v2125_v52  ;;  %v841_v54 = vpop.f32.mrb[5].mxu1 }
 0x2f8   : > { %v1898_v55 = vmul.f32 -1.442695, %v841_v54 }
 0x2f9   : > { %2375 = vpow2.f32 %v1899_v53 }
 0x2fa   : > { %2377 = vpow2.f32 %v1898_v55  ;;  %v2128_v56 = vpop.f32.mrb[6].mxu1 }
 0x2fb   : > { %v2368_v57 = vpop.eup %2367  ;;  %v1901_v58 = vmul.f32 -1.442695, %v2128_v56  ;;  %v851_v59 = vpop.f32.mrb[7].mxu1 }
 0x2fc   : > { %v2370_v61 = vpop.eup %2369  ;;  %v885_v62 = vadd.f32 1.0, %v2368_v57  ;;  %v1900_v16 = vmul.f32 -1.442695, %v851_v59 }
 0x2fd   : > { %v884_v17 = vadd.f32 1.0, %v2370_v61  ;;  %2379 = vpow2.f32 %v1901_v58 }
 0x2fe   : > { %2381 = vrcp.f32 %v885_v62 }
 0x2ff   : > { %v2372_v18 = vpop.eup %2371  ;;  %2383 = vrcp.f32 %v884_v17 }
 0x300   : > { %v2374_v19 = vpop.eup %2373  ;;  %v887_v20 = vadd.f32 1.0, %v2372_v18  ;;  %2385 = vpow2.f32 %v1900_v16 }
 0x301   : > { %v886_v21 = vadd.f32 1.0, %v2374_v19 }
 0x302   : > { %2387 = vrcp.f32 %v887_v20 }
 0x303   : > { %v2376_v22 = vpop.eup %2375  ;;  %2389 = vrcp.f32 %v886_v21 }
 0x304   : > { %v2378_v24 = vpop.eup %2377  ;;  %v889_v25 = vadd.f32 1.0, %v2376_v22 }
 0x305   : > { %v888_v26 = vadd.f32 1.0, %v2378_v24 }
 0x306   : > { %2391 = vrcp.f32 %v889_v25 }
 0x307   : > { %v2380_v27 = vpop.eup %2379  ;;  %2393 = vrcp.f32 %v888_v26 }
 0x308   : > { %v2382_v28 = vpop.eup %2381  ;;  %v891_v29 = vadd.f32 1.0, %v2380_v27 }
 0x309   : > { %v2384_v30 = vpop.eup %2383  ;;  %910 = vst.msk [vmem:[#allocation3 + $0x8] sm:$0xff] %vm908_vm5, %v2382_v28 }
 0x30a   : > { %v2386_v31 = vpop.eup %2385  ;;  %909 = vst.msk [vmem:[#allocation3] sm:$0xff] %vm908_vm5, %v2384_v30  ;;  %2395 = vrcp.f32 %v891_v29  ;;  %v1130_v30 = vld [vmem:[%s3248_s4] sm:$0xff] }
 0x30b   : > { %v890_v32 = vadd.f32 1.0, %v2386_v31 }
 0x30c   : > { %v2388_v33 = vpop.eup %2387 }
 0x30d   : > { %v2390_v34 = vpop.eup %2389  ;;  %912 = vst.msk [vmem:[#allocation3 + $0x18] sm:$0xff] %vm908_vm5, %v2388_v33  ;;  %2397 = vrcp.f32 %v890_v32 }
 0x30e   : > { %911 = vst.msk [vmem:[#allocation3 + $0x10] sm:$0xff] %vm908_vm5, %v2390_v34  ;;  %v2054_v35 = vpop.f32.mrb[8].mxu1 }
 0x30f   : > { %v2055_v36 = vpop.f32.mrb[9].mxu1 }
 0x310   : > { %v2392_v37 = vpop.eup %2391  ;;  %v2056_v38 = vadd.f32 %v2055_v36, %v2054_v35  ;;  %v1459_v45 = vld [vmem:[#allocation3 + $0x8] sm:$0xff] }
 0x311   : > { %v2394_v39 = vpop.eup %2393  ;;  %914 = vst.msk [vmem:[#allocation3 + $0x28] sm:$0xff] %vm908_vm5, %v2392_v37  ;;  %v1458_v40 = vld [vmem:[#allocation3] sm:$0xff] }
 0x312   : > { %913 = vst.msk [vmem:[#allocation3 + $0x20] sm:$0xff] %vm908_vm5, %v2394_v39  ;;  %v2057_v41 = vpop.f32.mrb[10].mxu1  ;;  %1927 = vmatmul.mubr.msk.f32.vlgmr.msra.gmra.mrb[24].mxu1 %vm908_vm5, %v1458_v40 }
 0x313   : > { %v2058_v42 = vpop.f32.mrb[11].mxu1  ;;  %1564 = vmatprep.mubr.f32.mxu1 %v2530_v63 }
 0x314   : > { %v2396_v43 = vpop.eup %2395  ;;  %v2059_v44 = vadd.f32 %v2058_v42, %v2057_v41  ;;  %v1461_v54 = vld [vmem:[#allocation3 + $0x18] sm:$0xff] }
 0x315   : > { %916 = vst.msk [vmem:[#allocation3 + $0x38] sm:$0xff] %vm908_vm5, %v2396_v43  ;;  %v1460_v50 = vld [vmem:[#allocation3 + $0x10] sm:$0xff] }
 0x316   : > { %v2239_v46 = vpack.c.bf16 %v2059_v44, %v2056_v38  ;;  %v2060_v47 = vpop.f32.mrb[12].mxu1  ;;  %1928 = vmatmul.mubr.msk.f32.gmra.mrb[26].mxu1 %vm908_vm5, %v1459_v45 }
 0x317   : > { %v2398_v48 = vpop.eup %2397  ;;  %v2061_v49 = vpop.f32.mrb[13].mxu1  ;;  %1570 = vmatprep.mubr.f32.mxu1 %v2530_v63 }
 0x318   : > { %915 = vst.msk [vmem:[#allocation3 + $0x30] sm:$0xff] %vm908_vm5, %v2398_v48  ;;  %v2062_v51 = vadd.f32 %v2061_v49, %v2060_v47  ;;  %2240 = vmatpush3.bf16.msra.mxu0 %v2239_v46  ;;  %v1463_v17 = vld [vmem:[#allocation3 + $0x28] sm:$0xff]  ;;  %v1132_v49 = vld [vmem:[%s3248_s4 + $0x10] sm:$0xff] }
 0x319   : > { %2241 = vmatprep.subr.bf16.mxu0 %v2528_v60  ;;  %v1462_v59 = vld [vmem:[#allocation3 + $0x20] sm:$0xff]  ;;  %v1131_v48 = vld [vmem:[%s3248_s4 + $0x8] sm:$0xff] }
 0x31a   : > { %v2063_v52 = vpop.f32.mrb[14].mxu1  ;;  %1929 = vmatmul.mubr.msk.f32.gmra.mrb[28].mxu1 %vm908_vm5, %v1460_v50  ;;  %v1133_v50 = vld [vmem:[%s3248_s4 + $0x18] sm:$0xff] }
 0x31b   : > { %v2064_v53 = vpop.f32.mrb[15].mxu1  ;;  %1576 = vmatprep.mubr.f32.mxu1 %v2530_v63 }
 0x31c   : > { %v2065_v55 = vadd.f32 %v2064_v53, %v2063_v52  ;;  %v1465_v27 = vld [vmem:[#allocation3 + $0x38] sm:$0xff]  ;;  %v1135_v52 = vld [vmem:[%s3248_s4 + $0x28] sm:$0xff]  ;;  %v1136_v53 = vld [vmem:[%s3248_s4 + $0x30] sm:$0xff] }
 0x31e   : > { %v2242_v56 = vpack.c.bf16 %v2065_v55, %v2062_v51  ;;  %v2066_v57 = vpop.f32.mrb[16].mxu1  ;;  %1930 = vmatmul.mubr.msk.f32.gmra.mrb[30].mxu1 %vm908_vm5, %v1461_v54  ;;  %v1134_v51 = vld [vmem:[%s3248_s4 + $0x20] sm:$0xff]  ;;  %v1137_v54 = vld [vmem:[%s3248_s4 + $0x38] sm:$0xff]  ;;  %v1317_v55 = vld [vmem:[%s3252_s8 + $0x8] sm:$0xff] }
 0x31f   : > { %v2067_v58 = vpop.f32.mrb[17].mxu1  ;;  %1582 = vmatprep.mubr.f32.mxu1 %v2530_v63  ;;  %v1464_v22 = vld [vmem:[#allocation3 + $0x30] sm:$0xff] }
 0x320   : > { %v2068_v61 = vadd.f32 %v2067_v58, %v2066_v57  ;;  %2243 = vmatpush3.bf16.msra.mxu0 %v2242_v56  ;;  %v1319_v56 = vld [vmem:[%s3252_s8 + $0x18] sm:$0xff]  ;;  %v1316_v57 = vld [vmem:[%s3252_s8] sm:$0xff] }
 0x321   : > { %2244 = vmatprep.subr.bf16.mxu0 %v2528_v60  ;;  %v2250_v58 = vpack.c.bf16 %v1319_v56, %v1317_v55  ;;  %v2262_v55 = vpack.c.bf16 %v2684_v7, %v2680_v5 }
 0x322   : > { %v2069_v62 = vpop.f32.mrb[18].mxu1  ;;  %1931 = vmatmul.mubr.msk.f32.gmra.mrb[32].mxu1 %vm908_vm5, %v1462_v59  ;;  %v1318_v59 = vld [vmem:[%s3252_s8 + $0x10] sm:$0xff] }
 0x323   : > { %v2070_v16 = vpop.f32.mrb[19].mxu1  ;;  %1588 = vmatprep.mubr.f32.mxu1 %v2530_v63 }
 0x324   : > { %v2071_v18 = vadd.f32 %v2070_v16, %v2069_v62  ;;  %v2258_v62 = vpack.c.bf16 %v2676_v3, %v2672_v1 }
 0x326   : > { %v2245_v19 = vpack.c.bf16 %v2071_v18, %v2068_v61  ;;  %v2072_v20 = vpop.f32.mrb[20].mxu1  ;;  %1932 = vmatmul.mubr.msk.f32.gmra.mrb[34].mxu1 %vm908_vm5, %v1463_v17  ;;  %v2252_v61 = vpack.c.bf16 %v1318_v59, %v1316_v57 }
 0x327   : > { %v2073_v21 = vpop.f32.mrb[21].mxu1  ;;  %1594 = vmatprep.mubr.f32.mxu1 %v2530_v63 }
 0x328   : > { %v2074_v24 = vadd.f32 %v2073_v21, %v2072_v20  ;;  %2246 = vmatpush3.bf16.msra.mxu0 %v2245_v19 }
 0x329   : > { %2247 = vmatprep.subr.bf16.mxu0 %v2528_v60 }
 0x32a   : > { %v2075_v25 = vpop.f32.mrb[22].mxu1  ;;  %1933 = vmatmul.mubr.msk.f32.gmra.mrb[36].mxu1 %vm908_vm5, %v1464_v22 }
 0x32b   : > { %v2076_v26 = vpop.f32.mrb[23].mxu1  ;;  %1600 = vmatprep.mubr.f32.mxu1 %v2530_v63 }
 0x32c   : > { %v2077_v28 = vadd.f32 %v2076_v26, %v2075_v25 }
 0x32e   : > { %v2248_v29 = vpack.c.bf16 %v2077_v28, %v2074_v24  ;;  %1934 = vmatmul.mubr.msk.f32.gmra.mrb[38].mxu1 %vm908_vm5, %v1465_v27 }
 0x330   : > { %2249 = vmatpush3.bf16.msra.mxu0 %v2248_v29 }
 0x333   : > { %2146 = vmatmul.mubr.msk.f32.vlgmr.msra.gmra.mrb[2].mxu0 %vm647_vm3, %v2837_v23 }
 0x334   : > { %2150 = vmatprep.mubr.msk.f32.mxu0 %vm730_vm4, %v1130_v30 }
 0x3e5   : > { %v3033_v60 = vpop.f32.mrb[24].mxu1 }
 0x3e6   : > { %v3035_v31 = vpop.f32.mrb[25].mxu1 }
 0x3e9   : > { %v3037_v32 = vpop.f32.mrb[26].mxu1 }
 0x3ea   : > { %v3039_v33 = vpop.f32.mrb[27].mxu1 }
 0x3ed   : > { %v3041_v34 = vpop.f32.mrb[28].mxu1 }
 0x3ee   : > { %v3043_v35 = vpop.f32.mrb[29].mxu1 }
 0x3f1   : > { %v3045_v36 = vpop.f32.mrb[30].mxu1 }
 0x3f2   : > { %v3047_v23 = vpop.f32.mrb[31].mxu1 }
 0x3f5   : > { %v3049_v37 = vpop.f32.mrb[32].mxu1 }
 0x3f6   : > { %v3051_v38 = vpop.f32.mrb[33].mxu1 }
 0x3f9   : > { %v3053_v39 = vpop.f32.mrb[34].mxu1 }
 0x3fa   : > { %v3055_v40 = vpop.f32.mrb[35].mxu1 }
 0x3fd   : > { %v3057_v41 = vpop.f32.mrb[36].mxu1 }
 0x3fe   : > { %v3059_v42 = vpop.f32.mrb[37].mxu1 }
 0x401   : > { %v3061_v43 = vpop.f32.mrb[38].mxu1 }
 0x402   : > { %v3063_v44 = vpop.f32.mrb[39].mxu1 }
 0x406   : > { %v1125_v45 = vpop.f32.mrb[2].mxu0 }
 0x407   : > { %v1129_v46 = vmax.f32 %v1125_v45, 0.0  ;;  %v2147_v47 = vpop.f32.mrb[3].mxu0 }
 0x409   : > { %2148 = vmatprep.subr.mxu0 %v1129_v46 }
 0x40a   : > { %2149 = vmatpush3.msra.mxu0 %v1129_v46 }
 0x40b   : > { %2151 = vmatmul.mubr.msk.f32.vlgmr.msra.gmra.mrb[4].mxu0 %vm730_vm4, %v1131_v48  ;;  %2251 = vmatprep.subr.bf16.mxu0 %v2250_v58  ;;  %v2264_v58 = vpack.c.bf16 %v2682_v6, %v2678_v4  ;;  %v2270_v4 = vpack.c.bf16 %v2700_v15, %v2696_v13  ;;  %v1607_v15 = vld [vmem:[%s3246_s2] sm:$0xff] }
 0x40c   : > { %2153 = vmatprep.mubr.msk.f32.mxu0 %vm730_vm4, %v1132_v49  ;;  %2253 = vmatpush1.bf16.msra.mxu0 %v2252_v61 }
 0x40d   : > { %2259 = vmatprep.subr.bf16.mxu0 %v2258_v62  ;;  %v2268_v62 = vpack.c.bf16 %v2690_v10, %v2686_v8 }
 0x40f   : > { %2154 = vmatmul.mubr.msk.f32.gmra.mrb[6].mxu0 %vm730_vm4, %v1133_v50 }
 0x410   : > { %2156 = vmatprep.mubr.msk.f32.mxu0 %vm730_vm4, %v1134_v51 }
 0x413   : > { %2157 = vmatmul.mubr.msk.f32.gmra.mrb[8].mxu0 %vm730_vm4, %v1135_v52 }
 0x414   : > { %2159 = vmatprep.mubr.msk.f32.mxu0 %vm730_vm4, %v1136_v53 }
 0x417   : > { %2160 = vmatmul.mubr.msk.f32.gmra.mrb[10].mxu0 %vm730_vm4, %v1137_v54  ;;  %v2260_v54 = vpack.c.bf16 %v2674_v2, %v2670_v0  ;;  %v2266_v0 = vpack.c.bf16 %v2692_v11, %v2688_v9  ;;  %v2272_v9 = vpack.c.bf16 %v2698_v14, %v2694_v12 }
 0x418   : > { %1409 = vmatprep.mubr.f32.mxu0 %v2530_v63 }
 0x4de   : > { %v2152_v16 = vpop.f32.mrb[4].mxu0 }
 0x4df   : > { %v1912_v17 = vmul.f32 -1.442695, %v2152_v16  ;;  %v1229_v18 = vpop.f32.mrb[5].mxu0 }
 0x4e0   : > { %v1911_v19 = vmul.f32 -1.442695, %v1229_v18  ;;  %v1609_v18 = vld [vmem:[%s3246_s2 + $0x10] sm:$0xff] }
 0x4e1   : > { %2399 = vpow2.f32 %v1912_v17  ;;  %v1608_v17 = vld [vmem:[%s3246_s2 + $0x8] sm:$0xff] }
 0x4e2   : > { %2401 = vpow2.f32 %v1911_v19  ;;  %v2155_v20 = vpop.f32.mrb[6].mxu0  ;;  %v1610_v19 = vld [vmem:[%s3246_s2 + $0x18] sm:$0xff] }
 0x4e3   : > { %v1239_v21 = vpop.f32.mrb[7].mxu0  ;;  %v1914_v24 = vmul.f32 -1.442695, %v2155_v20 }
 0x4e4   : > { %v1913_v22 = vmul.f32 -1.442695, %v1239_v21 }
 0x4e6   : > { %2403 = vpow2.f32 %v1913_v22  ;;  %v2158_v25 = vpop.f32.mrb[8].mxu0 }
 0x4e7   : > { %v1249_v26 = vpop.f32.mrb[9].mxu0  ;;  %2405 = vpow2.f32 %v1914_v24  ;;  %v1916_v45 = vmul.f32 -1.442695, %v2158_v25 }
 0x4e8   : > { %v1915_v27 = vmul.f32 -1.442695, %v1249_v26 }
 0x4ea   : > { %v2161_v28 = vpop.f32.mrb[10].mxu0  ;;  %2407 = vpow2.f32 %v1915_v27 }
 0x4eb   : > { %v2400_v29 = vpop.eup %2399  ;;  %v1259_v30 = vpop.f32.mrb[11].mxu0  ;;  %v1918_v52 = vmul.f32 -1.442695, %v2161_v28 }
 0x4ec   : > { %v2402_v1 = vpop.eup %2401  ;;  %v1293_v46 = vadd.f32 1.0, %v2400_v29  ;;  %v1917_v48 = vmul.f32 -1.442695, %v1259_v30 }
 0x4ed   : > { %v1292_v3 = vadd.f32 1.0, %v2402_v1 }
 0x4ef   : > { %2409 = vrcp.f32 %v1292_v3 }
 0x4f0   : > { %v2404_v47 = vpop.eup %2403  ;;  %2411 = vpow2.f32 %v1916_v45 }
 0x4f1   : > { %v1294_v49 = vadd.f32 1.0, %v2404_v47  ;;  %2413 = vrcp.f32 %v1293_v46  ;;  %v2406_v50 = vpop.eup %2405 }
 0x4f2   : > { %2415 = vpow2.f32 %v1917_v48  ;;  %v1295_v53 = vadd.f32 1.0, %v2406_v50 }
 0x4f3   : > { %2417 = vrcp.f32 %v1294_v49 }
 0x4f4   : > { %v2408_v51 = vpop.eup %2407  ;;  %2419 = vpow2.f32 %v1918_v52 }
 0x4f5   : > { %v1296_v57 = vadd.f32 1.0, %v2408_v51  ;;  %2421 = vrcp.f32 %v1295_v53 }
 0x4f7   : > { %2423 = vrcp.f32 %v1296_v57 }
 0x4f9   : > { %v2410_v56 = vpop.eup %2409 }
 0x4fa   : > { %1919 = vmatmul.mubr.msk.f32.vlgmr.msra.gmra.mrb[12].mxu0 %vm908_vm5, %v2410_v56  ;;  %v2412_v59 = vpop.eup %2411 }
 0x4fb   : > { %1415 = vmatprep.mubr.f32.mxu0 %v2530_v63  ;;  %2261 = vmatpush1.bf16.msra.mxu0 %v2260_v54  ;;  %v2414_v2 = vpop.eup %2413  ;;  %v1297_v61 = vadd.f32 1.0, %v2412_v59 }
 0x4fc   : > { %2263 = vmatprep.subr.bf16.mxu0 %v2262_v55  ;;  %v2416_v5 = vpop.eup %2415 }
 0x4fd   : > { %v2418_v7 = vpop.eup %2417  ;;  %v1298_v6 = vadd.f32 1.0, %v2416_v5  ;;  %2425 = vrcp.f32 %v1297_v61 }
 0x4fe   : > { %1920 = vmatmul.mubr.msk.f32.gmra.mrb[14].mxu0 %vm908_vm5, %v2414_v2  ;;  %v2420_v11 = vpop.eup %2419 }
 0x4ff   : > { %1421 = vmatprep.mubr.f32.mxu0 %v2530_v63  ;;  %2265 = vmatpush1.bf16.msra.mxu0 %v2264_v58  ;;  %v2422_v16 = vpop.eup %2421  ;;  %2427 = vrcp.f32 %v1298_v6  ;;  %v1299_v10 = vadd.f32 1.0, %v2420_v11 }
 0x500   : > { %2267 = vmatprep.subr.bf16.mxu0 %v2266_v0 }
 0x501   : > { %v2424_v8 = vpop.eup %2423  ;;  %2429 = vrcp.f32 %v1299_v10 }
 0x502   : > { %1921 = vmatmul.mubr.msk.f32.gmra.mrb[16].mxu0 %vm908_vm5, %v2418_v7 }
 0x503   : > { %1427 = vmatprep.mubr.f32.mxu0 %v2530_v63  ;;  %2269 = vmatpush1.bf16.msra.mxu0 %v2268_v62 }
 0x504   : > { %2271 = vmatprep.subr.bf16.mxu0 %v2270_v4 }
 0x506   : > { %1922 = vmatmul.mubr.msk.f32.gmra.mrb[18].mxu0 %vm908_vm5, %v2422_v16 }
 0x507   : > { %1433 = vmatprep.mubr.f32.mxu0 %v2530_v63  ;;  %2273 = vmatpush1.bf16.msra.mxu0 %v2272_v9  ;;  %v2426_v13 = vpop.eup %2425 }
 0x509   : > { %v2428_v12 = vpop.eup %2427 }
 0x50a   : > { %1923 = vmatmul.mubr.msk.f32.gmra.mrb[20].mxu0 %vm908_vm5, %v2424_v8 }
 0x50b   : > { %1439 = vmatprep.mubr.f32.mxu0 %v2530_v63  ;;  %v2430_v14 = vpop.eup %2429 }
 0x50e   : > { %1924 = vmatmul.mubr.msk.f32.gmra.mrb[22].mxu0 %vm908_vm5, %v2426_v13 }
 0x50f   : > { %1445 = vmatprep.mubr.f32.mxu0 %v2530_v63 }
 0x512   : > { %1925 = vmatmul.mubr.msk.f32.gmra.mrb[24].mxu0 %vm908_vm5, %v2428_v12 }
 0x513   : > { %1451 = vmatprep.mubr.f32.mxu0 %v2530_v63 }
 0x516   : > { %1926 = vmatmul.mubr.msk.f32.gmra.mrb[26].mxu0 %vm908_vm5, %v2430_v14 }
 0x517   : > { %1687 = vmatprep.mubr.f32.mxu0 %v2530_v63 }
 0x51a   : > { %1935 = vmatmul.mubr.msk.f32.vlgmr.msra.gmra.mrb[28].mxu0 %vm647_vm3, %v1607_v15 }
 0x51b   : > { %1693 = vmatprep.mubr.f32.mxu0 %v2530_v63 }
 0x51e   : > { %1936 = vmatmul.mubr.msk.f32.gmra.mrb[30].mxu0 %vm647_vm3, %v1608_v17 }
 0x51f   : > { %1699 = vmatprep.mubr.f32.mxu0 %v2530_v63 }
 0x522   : > { %1937 = vmatmul.mubr.msk.f32.gmra.mrb[32].mxu0 %vm647_vm3, %v1609_v18 }
 0x523   : > { %1705 = vmatprep.mubr.f32.mxu0 %v2530_v63 }
 0x526   : > { %1938 = vmatmul.mubr.msk.f32.gmra.mrb[34].mxu0 %vm647_vm3, %v1610_v19 }
 0x5cd   : > { %v1411_v20 = vpop.f32.mrb[12].mxu0 }
 0x5ce   : > { %v1712_v21 = vmul.f32 %v3033_v60, %v1411_v20  ;;  %v1413_v22 = vpop.f32.mrb[13].mxu0 }
 0x5cf   : > { %v1713_v24 = vmul.f32 %v3035_v31, %v1413_v22 }
 0x5d1   : > { %v1417_v25 = vpop.f32.mrb[14].mxu0 }
 0x5d2   : > { %v1714_v26 = vmul.f32 %v3037_v32, %v1417_v25  ;;  %v1419_v27 = vpop.f32.mrb[15].mxu0 }
 0x5d3   : > { %v1715_v28 = vmul.f32 %v3039_v33, %v1419_v27 }
 0x5d5   : > { %v1423_v29 = vpop.f32.mrb[16].mxu0 }
 0x5d6   : > { %v1716_v63 = vmul.f32 %v3041_v34, %v1423_v29  ;;  %v1425_v30 = vpop.f32.mrb[17].mxu0 }
 0x5d7   : > { %v1717_v1 = vmul.f32 %v3043_v35, %v1425_v30 }
 0x5d9   : > { %v1429_v3 = vpop.f32.mrb[18].mxu0 }
 0x5da   : > { %v1718_v45 = vmul.f32 %v3045_v36, %v1429_v3  ;;  %v1431_v46 = vpop.f32.mrb[19].mxu0 }
 0x5db   : > { %v1719_v60 = vmul.f32 %v3047_v23, %v1431_v46 }
 0x5dd   : > { %v1435_v47 = vpop.f32.mrb[20].mxu0 }
 0x5de   : > { %v1720_v31 = vmul.f32 %v3049_v37, %v1435_v47  ;;  %v1437_v48 = vpop.f32.mrb[21].mxu0 }
 0x5df   : > { %v1721_v32 = vmul.f32 %v3051_v38, %v1437_v48 }
 0x5e0   : > { %v1728_v49 = vadd.f32 %v1720_v31, %v1712_v21 }
 0x5e1   : > { %v1441_v33 = vpop.f32.mrb[22].mxu0  ;;  %v1729_v50 = vadd.f32 %v1721_v32, %v1713_v24 }
 0x5e2   : > { %v1722_v34 = vmul.f32 %v3053_v39, %v1441_v33  ;;  %v1443_v51 = vpop.f32.mrb[23].mxu0 }
 0x5e3   : > { %v1723_v35 = vmul.f32 %v3055_v40, %v1443_v51 }
 0x5e4   : > { %v1730_v52 = vadd.f32 %v1722_v34, %v1714_v26 }
 0x5e5   : > { %v1447_v53 = vpop.f32.mrb[24].mxu0  ;;  %v1731_v36 = vadd.f32 %v1723_v35, %v1715_v28 }
 0x5e6   : > { %v1724_v23 = vmul.f32 %v3057_v41, %v1447_v53  ;;  %v1449_v54 = vpop.f32.mrb[25].mxu0 }
 0x5e7   : > { %v1725_v37 = vmul.f32 %v3059_v42, %v1449_v54 }
 0x5e8   : > { %v1732_v55 = vadd.f32 %v1724_v23, %v1716_v63 }
 0x5e9   : > { %v1453_v38 = vpop.f32.mrb[26].mxu0  ;;  %v1733_v56 = vadd.f32 %v1725_v37, %v1717_v1 }
 0x5ea   : > { %v1726_v57 = vmul.f32 %v3061_v43, %v1453_v38  ;;  %v1455_v39 = vpop.f32.mrb[27].mxu0 }
 0x5eb   : > { %v1727_v40 = vmul.f32 %v3063_v44, %v1455_v39 }
 0x5ec   : > { %v1734_v58 = vadd.f32 %v1726_v57, %v1718_v45 }
 0x5ed   : > { %v1689_v59 = vpop.f32.mrb[28].mxu0  ;;  %v1735_v0 = vadd.f32 %v1727_v40, %v1719_v60 }
 0x5ee   : > { %v1736_v2 = vmul.f32 %v1728_v49, %v1689_v59  ;;  %v1691_v41 = vpop.f32.mrb[29].mxu0 }
 0x5ef   : > { %v1737_v5 = vmul.f32 %v1729_v50, %v1691_v41 }
 0x5f0   : > { %1744 = vst [vmem:[%s2702_s23] sm:$0xff] %v1736_v2 }
 0x5f1   : > { %1745 = vst [vmem:[%s2702_s23 + $0x8] sm:$0xff] %v1737_v5  ;;  %v1695_v42 = vpop.f32.mrb[30].mxu0 }
 0x5f2   : > { %v1738_v7 = vmul.f32 %v1730_v52, %v1695_v42  ;;  %v1697_v61 = vpop.f32.mrb[31].mxu0 }
 0x5f3   : > { %v1739_v43 = vmul.f32 %v1731_v36, %v1697_v61 }
 0x5f4   : > { %1746 = vst [vmem:[%s2702_s23 + $0x10] sm:$0xff] %v1738_v7 }
 0x5f5   : > { %1747 = vst [vmem:[%s2702_s23 + $0x18] sm:$0xff] %v1739_v43  ;;  %v1701_v62 = vpop.f32.mrb[32].mxu0 }
 0x5f6   : > { %v1740_v44 = vmul.f32 %v1732_v55, %v1701_v62  ;;  %v1703_v4 = vpop.f32.mrb[33].mxu0 }
 0x5f7   : > { %v1741_v6 = vmul.f32 %v1733_v56, %v1703_v4 }
 0x5f8   : > { %1748 = vst [vmem:[%s2702_s23 + $0x20] sm:$0xff] %v1740_v44 }
 0x5f9   : > { %1749 = vst [vmem:[%s2702_s23 + $0x28] sm:$0xff] %v1741_v6  ;;  %v1707_v9 = vpop.f32.mrb[34].mxu0 }
 0x5fa   : > { %v1742_v11 = vmul.f32 %v1734_v58, %v1707_v9  ;;  %v1709_v16 = vpop.f32.mrb[35].mxu0 }
 0x5fb   : > { %v1743_v8 = vmul.f32 %v1735_v0, %v1709_v16 }
 0x5fc   : > { %1750 = vst [vmem:[%s2702_s23 + $0x30] sm:$0xff] %v1742_v11 }
 0x5fd   : > { %1751 = vst [vmem:[%s2702_s23 + $0x38] sm:$0xff] %v1743_v8 }
 0x5fe PF: > { %s1947_s21 = sshll.u32 %s2513_s17, 10  ;;  %s1769_s30 = sshll.u32 %s2702_s23, 4  ;;  %s3188_s30 = int_to_ptr.vmem [resolvable:$true] %s1769_s30 }
 0x5ff   : > { %s3185_s28 = scalar_lea.hbm %s3254_s10, %s1947_s21  ;;  %s3265_s19 = sand.u32 1, %s2501_s14  }
 0x600   : > { %s3192_s24 = scalar_lea.sflag [#allocation5], %s3265_s19  ;;  %s2431_s11 = scalar_lea.vmem %s3188_s30, 1024 }
 0x601   : > { %p2432_p2 = scmp.ne.s32.totalorder %s3188_s30, %s2431_s11  ;;  %s2531_s17 = smov [#allocation4]  }
 0x602   : > { %s2435_s0 = sshll.u32 %s2531_s17, 4  ;;  %s2436_s0 = int_to_ptr.vmem [resolvable:$false] %s2435_s0 }
 0x603   : > { %p2433_p4 = pnand %p2432_p2, %p2638_p3  ;;  %s2437_s12 = scalar_lea.vmem %s2436_s0, 2048 }
 0x604   : > { %p2438_p6 = scmp.lt.s32.totalorder %s3188_s30, %s2436_s0  ;;  %p2439_p7 = scmp.lt.s32.totalorder %s2437_s12, %s2431_s11 }
 0x605   : > { %p2434_p5 = pneg %p2433_p4 }
 0x606   : > { %p2440_p8 = por %p2439_p7, %p2438_p6 }
 0x608   : > { %p2441_p10 = pnand %p2440_p8, %p2434_p5 }
 0x60a   : > { %2444 = shalt.err (!%p2441_p10)
}
 0x60b   : > { %s2445_s23 = scalar_lea.hbm %s3185_s28, 1024  ;;  %s2449_s22 = scalar_lea.hbm %s3254_s10, 2048 }
 0x60c   : > { %p2446_p11 = scmp.ne.s32.totalorder %s3185_s28, %s2445_s23  ;;  %p2450_p0 = scmp.lt.u32.totalorder %s3185_s28, %s3254_s10 }
 0x60d   : > { %p2451_p1 = scmp.lt.u32.totalorder %s2449_s22, %s2445_s23  ;;  %p2453_p4 = scmp.lt.u32.totalorder %s2445_s23, %s3185_s28 }
 0x60e   : > { %p2447_p12 = pnand %p2446_p11, %p2638_p3 }
 0x60f   : > { %p2452_p2 = por %p2451_p1, %p2450_p0 }
 0x610   : > { %p2448_p13 = pneg %p2447_p12 }
 0x611   : > { %p2454_p5 = por %p2453_p4, %p2452_p2 }
 0x613   : > { %p2455_p6 = pnand %p2454_p5, %p2448_p13 }
 0x615   : > { %2458 = shalt.err (!%p2455_p6)
}
 0x616   : > { %s2532_s11 = smov 256   ;;  %s2533_s17 = smov 16  }
 0x617   : > { %2290 = dma.vmem_to_hbm [thread:$0]  (%p2638_p3), %s3188_s30, 1024, %s3185_s28, %s3192_s24, %s2532_s11, %s2532_s11, %s2533_s17  }
 0x618 PF: > { %p2296_p7 = scmp.ge.s32.totalorder %s2525_s20, 2  ;;  %s1784_s0 = sand.u32 1, %s2497_s13  }
 0x619   : > { %s1785_s12 = scalar_lea.sflag [#allocation5], %s1784_s0 }
 0x61a   : > { %p2293_p8 = pnand %p2296_p7, %p2648_p9 }
 0x61c   : > { %2492 = dma.done.wait (!%p2293_p8), %s1785_s12, 1024  }
 0x61d   : > { %2494 = vsyncadd (!%p2293_p8), %s1785_s12, 4294966272  ;;  %s23_s20 = sadd.s32 1, %s2525_s20   ;;  %s3266_s17 = sld [smem:[#allocation7_spill]] }
 0x61e   : > { %p20_p10 = scmp.ge.s32.totalorder %s23_s20, 6   ;;  %s3267_s25 = sld [smem:[#allocation8_spill]] }
 0x61f   : > { %s3268_s19 = sld [smem:[#allocation9_spill]]  ;;  %s3269_s13 = smov %s2501_s14 }
 0x620   : > { %s3270_s14 = smov %s2505_s15  ;;  %s3271_s15 = smov %s2656_s29 }
 0x621   : > { %s3272_s16 = smov %s2517_s18  ;;  %22 = sbr.rel (!%p20_p10) target bundleno = 7 (0x7), region = 114 }
 0x624   : > { %s3273_s18 = smov %s3267_s25 }
 0x628   :  { %1790 = vsyncpa [#allocation5], 1 }
 0x629   :  { %1792 = vsyncpa [#allocation5 + $0x1], 1 }

</bundles_post_ra>
